<compile_context>
chip_gen: v6e
topology: v6e:2x2x1
jax: 0.10.0
libtpu: 0.0.40
codegen_flags: <defaults>
</compile_context>

<pallas_src>
import functools
import math

import jax
import jax.numpy as jnp
from jax.experimental import pallas as pl
from jax.experimental.pallas import tpu as pltpu


# ----------------------------------------------------------------------------
# Generation-aware VMEM limit (v5e/v6e: 128 MiB physical -> 96 MiB scoped,
# v7x: 64 MiB physical -> 48 MiB scoped).
# ----------------------------------------------------------------------------
@functools.lru_cache(maxsize=None)
def _vmem_limit_bytes():
    cap = 64 * 1024 * 1024
    try:
        info = pltpu.get_tpu_info()
        cap = int(getattr(info, "vmem_capacity_bytes", cap))
    except Exception:
        pass
    return int(min(100 * 1024 * 1024, (cap * 3) // 4))


def _cparams(dims):
    return pltpu.CompilerParams(
        dimension_semantics=dims, vmem_limit_bytes=_vmem_limit_bytes())


def _divisor_tile(n, pref, align):
    """Largest t <= pref with n % t == 0 and t % align == 0, else n (full)."""
    for t in range(min(pref, n), 0, -1):
        if n % t == 0 and t % align == 0:
            return t
    return n


# ----------------------------------------------------------------------------
# In-kernel RMSNorm of a (rows, dim) tile; matches `_norm(x.float()).type_as(x)`
# ----------------------------------------------------------------------------
def _rms_norm_tile(x_ref, g_ref, eps, use_mup):
    x = x_ref[...]
    xf = x.astype(jnp.float32)
    inv_d = 1.0 / x.shape[-1]                               # folded at trace time
    ms = jnp.sum(xf * xf, axis=-1, keepdims=True) * inv_d   # mean of squares
    y = (xf * jax.lax.rsqrt(ms + eps)).astype(x.dtype)
    if not use_mup:
        y = y * g_ref[...].astype(y.dtype)
    return y


# ----------------------------------------------------------------------------
# Kernel 1: fused RMSNorm + matmul (QKV projection), column-streamed weights
# ----------------------------------------------------------------------------
def _norm_matmul_kernel(*refs, eps, use_mup):
    if use_mup:
        x_ref, w_ref, o_ref = refs
        g_ref = None
    else:
        x_ref, g_ref, w_ref, o_ref = refs
    y = _rms_norm_tile(x_ref, g_ref, eps, use_mup)
    o_ref[...] = jnp.dot(
        y, w_ref[...], preferred_element_type=jnp.float32).astype(o_ref.dtype)


def fused_norm_matmul(x2d, gamma, w, *, eps, use_mup, row_tile=256, col_tile=256):
    """out = RMSNorm(x2d) @ w; the normalized activation never leaves VMEM."""
    n, d = x2d.shape
    m = w.shape[1]
    tm = _divisor_tile(n, row_tile, 8)
    tn = _divisor_tile(m, col_tile, 128)

    in_specs = [pl.BlockSpec((tm, d), lambda i, j: (i, 0))]
    args = [x2d]
    if not use_mup:
        in_specs.append(pl.BlockSpec((1, d), lambda i, j: (0, 0)))
        args.append(gamma.reshape(1, d))
    in_specs.append(pl.BlockSpec((d, tn), lambda i, j: (0, j)))   # streamed weight
    args.append(w)

    return pl.pallas_call(
        functools.partial(_norm_matmul_kernel, eps=eps, use_mup=use_mup),
        out_shape=jax.ShapeDtypeStruct((n, m), x2d.dtype),
        grid_spec=pltpu.PrefetchScalarGridSpec(
            num_scalar_prefetch=0,
            grid=(n // tm, m // tn),
            in_specs=in_specs,
            out_specs=pl.BlockSpec((tm, tn), lambda i, j: (i, j))),
        compiler_params=_cparams(("parallel", "parallel")),
    )(*args)


# ----------------------------------------------------------------------------
# Kernel 2: flash attention, reading/writing (B*L, heads*d_head) 2-D layouts
# ----------------------------------------------------------------------------
def _flash_attention_kernel(q_ref, k_ref, v_ref, o_ref, m_sc, l_sc, acc_sc, *,
                            n_heads, n_kv_heads, d_head, scale, causal, tq, tk):
    i = pl.program_id(1)          # q tile
    j = pl.program_id(2)          # kv tile (innermost, "arbitrary")
    kv_rep = n_heads // n_kv_heads

    @pl.when(j == 0)
    def _():
        m_sc[...] = jnp.full_like(m_sc, -jnp.inf)
        l_sc[...] = jnp.zeros_like(l_sc)
        acc_sc[...] = jnp.zeros_like(acc_sc)

    def process_block():
        if causal:
            q_pos = i * tq + jax.lax.broadcasted_iota(jnp.int32, (tq, tk), 0)
            k_pos = j * tk + jax.lax.broadcasted_iota(jnp.int32, (tq, tk), 1)
            keep = k_pos <= q_pos
        # TODO(synk): for very large n_heads switch to lax.fori_loop over heads.
        for h in range(n_heads):
            hk = h // kv_rep                      # GQA: share KV columns, no repeat
            qh = q_ref[:, h * d_head:(h + 1) * d_head] * scale   # scale q, not s
            kh = k_ref[:, hk * d_head:(hk + 1) * d_head]
            vh = v_ref[:, hk * d_head:(hk + 1) * d_head]
            s = jax.lax.dot_general(qh, kh, (((1,), (1,)), ((), ())),
                                    preferred_element_type=jnp.float32)  # (tq, tk)
            if causal:
                s = jnp.where(keep, s, -1e30)
            m_prev = m_sc[h]
            m_new = jnp.maximum(m_prev, jnp.max(s, axis=-1, keepdims=True))
            alpha = jnp.exp(m_prev - m_new)
            p = jnp.exp(s - m_new)
            l_sc[h] = alpha * l_sc[h] + jnp.sum(p, axis=-1, keepdims=True)
            pv = jax.lax.dot_general(p.astype(vh.dtype), vh,
                                     (((1,), (0,)), ((), ())),
                                     preferred_element_type=jnp.float32)
            acc_sc[h] = alpha * acc_sc[h] + pv
            m_sc[h] = m_new

    if causal:
        # Skip KV blocks entirely above the causal diagonal.
        @pl.when(j * tk < (i + 1) * tq)
        def _():
            process_block()
    else:
        process_block()

    @pl.when(j == pl.num_programs(2) - 1)
    def _():
        for h in range(n_heads):
            inv_l = pl.reciprocal(l_sc[h], approx=True)       # EUP slot
            o_ref[:, h * d_head:(h + 1) * d_head] = (
                acc_sc[h] * inv_l).astype(o_ref.dtype)


def flash_attention(q2d, k2d, v2d, *, batch, seq_len, n_heads, n_kv_heads,
                    scale, causal, q_tile=256, kv_tile=256):
    """q2d: (B*L, H*dh), k2d/v2d: (B*L, Hkv*dh) -> (B*L, H*dh)."""
    n, d_model = q2d.shape
    d_head = d_model // n_heads
    dkv = k2d.shape[1]
    tq = _divisor_tile(seq_len, q_tile, 8)
    tk = _divisor_tile(seq_len, kv_tile, 8)
    q_blocks = seq_len // tq
    kv_blocks = seq_len // tk

    kernel = functools.partial(
        _flash_attention_kernel, n_heads=n_heads, n_kv_heads=n_kv_heads,
        d_head=d_head, scale=scale, causal=causal, tq=tq, tk=tk)

    return pl.pallas_call(
        kernel,
        out_shape=jax.ShapeDtypeStruct((n, d_model), q2d.dtype),
        grid_spec=pltpu.PrefetchScalarGridSpec(
            num_scalar_prefetch=0,
            grid=(batch, q_blocks, kv_blocks),
            in_specs=[
                pl.BlockSpec((tq, d_model), lambda b, i, j: (b * q_blocks + i, 0)),
                pl.BlockSpec((tk, dkv), lambda b, i, j: (b * kv_blocks + j, 0)),
                pl.BlockSpec((tk, dkv), lambda b, i, j: (b * kv_blocks + j, 0)),
            ],
            out_specs=pl.BlockSpec((tq, d_model),
                                   lambda b, i, j: (b * q_blocks + i, 0)),
            scratch_shapes=[
                pltpu.VMEM((n_heads, tq, 1), jnp.float32),       # running max
                pltpu.VMEM((n_heads, tq, 1), jnp.float32),       # running denom
                pltpu.VMEM((n_heads, tq, d_head), jnp.float32),  # accumulator
            ]),
        compiler_params=_cparams(("parallel", "parallel", "arbitrary")),
    )(q2d, k2d, v2d)


# ----------------------------------------------------------------------------
# Kernel 3: c_proj + first residual, column-streamed weight
# ----------------------------------------------------------------------------
def _matmul_residual_kernel(a_ref, w_ref, r_ref, o_ref):
    y = jnp.dot(a_ref[...], w_ref[...], preferred_element_type=jnp.float32)
    o_ref[...] = (r_ref[...].astype(jnp.float32) + y).astype(o_ref.dtype)


def fused_matmul_residual(a2d, w, r2d, *, row_tile=256, col_tile=256):
    """out = r2d + a2d @ w."""
    n, d_in = a2d.shape
    d_out = w.shape[1]
    tm = _divisor_tile(n, row_tile, 8)
    tn = _divisor_tile(d_out, col_tile, 128)

    return pl.pallas_call(
        _matmul_residual_kernel,
        out_shape=jax.ShapeDtypeStruct((n, d_out), a2d.dtype),
        grid_spec=pltpu.PrefetchScalarGridSpec(
            num_scalar_prefetch=0,
            grid=(n // tm, d_out // tn),
            in_specs=[
                pl.BlockSpec((tm, d_in), lambda i, j: (i, 0)),
                pl.BlockSpec((d_in, tn), lambda i, j: (0, j)),
                pl.BlockSpec((tm, tn), lambda i, j: (i, j)),
            ],
            out_specs=pl.BlockSpec((tm, tn), lambda i, j: (i, j))),
        compiler_params=_cparams(("parallel", "parallel")),
    )(a2d, w, r2d)


# ----------------------------------------------------------------------------
# Kernel 4: fused RMSNorm + SwiGLU MLP + second residual, d_ff streamed
# ----------------------------------------------------------------------------
def _norm_mlp_residual_kernel(*refs, eps, use_mup):
    if use_mup:
        x_ref, w1_ref, w3_ref, w2_ref, o_ref, y_sc, acc_sc = refs
        g_ref = None
    else:
        x_ref, g_ref, w1_ref, w3_ref, w2_ref, o_ref, y_sc, acc_sc = refs
    f = pl.program_id(1)

    @pl.when(f == 0)
    def _():
        y_sc[...] = _rms_norm_tile(x_ref, g_ref, eps, use_mup)   # norm once/row tile
        acc_sc[...] = jnp.zeros_like(acc_sc)

    y = y_sc[...]
    h1 = jnp.dot(y, w1_ref[...], preferred_element_type=jnp.float32)
    h3 = jnp.dot(y, w3_ref[...], preferred_element_type=jnp.float32)
    ff = ((h1 * jax.nn.sigmoid(h1)) * h3).astype(y.dtype)        # SiLU(fc1)*fc3
    acc_sc[...] += jnp.dot(ff, w2_ref[...], preferred_element_type=jnp.float32)

    @pl.when(f == pl.num_programs(1) - 1)
    def _():
        o_ref[...] = (x_ref[...].astype(jnp.float32) + acc_sc[...]).astype(o_ref.dtype)


def fused_norm_mlp_residual(x2d, gamma, w1, w3, w2, *, eps, use_mup,
                            row_tile=256, ff_tile=256):
    """out = x2d + fc2(SiLU(fc1(RMSNorm(x2d))) * fc3(RMSNorm(x2d)))."""
    n, d = x2d.shape
    f_dim = w1.shape[1]
    tm = _divisor_tile(n, row_tile, 8)
    tf = _divisor_tile(f_dim, ff_tile, 128)

    in_specs = [pl.BlockSpec((tm, d), lambda i, f: (i, 0))]
    args = [x2d]
    if not use_mup:
        in_specs.append(pl.BlockSpec((1, d), lambda i, f: (0, 0)))
        args.append(gamma.reshape(1, d))
    in_specs += [
        pl.BlockSpec((d, tf), lambda i, f: (0, f)),
        pl.BlockSpec((d, tf), lambda i, f: (0, f)),
        pl.BlockSpec((tf, d), lambda i, f: (f, 0)),
    ]
    args += [w1, w3, w2]

    return pl.pallas_call(
        functools.partial(_norm_mlp_residual_kernel, eps=eps, use_mup=use_mup),
        out_shape=jax.ShapeDtypeStruct((n, d), x2d.dtype),
        grid_spec=pltpu.PrefetchScalarGridSpec(
            num_scalar_prefetch=0,
            grid=(n // tm, f_dim // tf),
            in_specs=in_specs,
            out_specs=pl.BlockSpec((tm, d), lambda i, f: (i, 0)),
            scratch_shapes=[pltpu.VMEM((tm, d), x2d.dtype),      # cached norm
                            pltpu.VMEM((tm, d), jnp.float32)]),  # f32 accumulator
        compiler_params=_cparams(("parallel", "arbitrary")),
    )(*args)


# ----------------------------------------------------------------------------
# DecoderLayer forward (cache=None path)
# ----------------------------------------------------------------------------
def prepare_params(params):
    """One-time init-side weight fusion (hoisted out of the forward path)."""
    p = dict(params)
    p["wqkv"] = jnp.concatenate([params["wq"], params["wk"], params["wv"]], axis=1)
    return p


def decoder_layer(x, params, *, n_heads, n_kv_heads, eps, use_mup, cache=None):
    # TODO(synk): cache != None (KV-cache decode) and pos_emb='rope' paths not
    # implemented; only the dataclass-default flash path is covered.
    assert cache is None, "only the cache=None path is implemented"
    B, L, D = x.shape
    d_head = D // n_heads
    dkv = n_kv_heads * d_head
    x2d = x.reshape(B * L, D)

    gamma_attn = None if use_mup else params["attn_norm_w"]
    gamma_mlp = None if use_mup else params["mlp_norm_w"]

    # fused attention_norm + concatenated QKV projection (weights streamed)
    qkv = fused_norm_matmul(x2d, gamma_attn, params["wqkv"], eps=eps, use_mup=use_mup)
    q2d = qkv[:, :D]
    k2d = qkv[:, D:D + dkv]
    v2d = qkv[:, D + dkv:]

    # flash attention straight on the 2-D (B*L, heads*d_head) layouts
    scale = (math.sqrt(d_head) / d_head) if use_mup else (1.0 / math.sqrt(d_head))
    attn2d = flash_attention(q2d, k2d, v2d, batch=B, seq_len=L,
                             n_heads=n_heads, n_kv_heads=n_kv_heads,
                             scale=scale, causal=(L != 1))

    # c_proj + first residual
    h2d = fused_matmul_residual(attn2d, params["wc"], x2d)

    # fused mlp_norm + SwiGLU MLP (d_ff streamed) + second residual
    out2d = fused_norm_mlp_residual(h2d, gamma_mlp, params["w1"], params["w3"],
                                    params["w2"], eps=eps, use_mup=use_mup)
    return out2d.reshape(B, L, D), cache


# ----------------------------------------------------------------------------
# Pure-JAX reference (mirrors the PyTorch module, dropout=0, bias=False)
# ----------------------------------------------------------------------------
def decoder_layer_reference(x, params, *, n_heads, n_kv_heads, eps, use_mup):
    B, L, D = x.shape
    dh = D // n_heads
    kv_rep = n_heads // n_kv_heads

    def rms(t, w):
        tf = t.astype(jnp.float32)
        y = tf * jax.lax.rsqrt(jnp.mean(tf * tf, axis=-1, keepdims=True) + eps)
        y = y.astype(t.dtype)
        return y if use_mup else y * w.astype(y.dtype)

    h = rms(x, params["attn_norm_w"])
    q = (h @ params["wq"]).reshape(B, L, n_heads, dh).transpose(0, 2, 1, 3)
    k = (h @ params["wk"]).reshape(B, L, n_kv_heads, dh).transpose(0, 2, 1, 3)
    v = (h @ params["wv"]).reshape(B, L, n_kv_heads, dh).transpose(0, 2, 1, 3)
    if kv_rep > 1:
        k = jnp.repeat(k, kv_rep, axis=1)
        v = jnp.repeat(v, kv_rep, axis=1)
    scale = (math.sqrt(dh) / dh) if use_mup else (1.0 / math.sqrt(dh))
    s = jnp.einsum("bhqd,bhkd->bhqk", q, k) * scale
    if L != 1:
        mask = jnp.tril(jnp.ones((L, L), dtype=bool))
        s = jnp.where(mask[None, None], s, -jnp.inf)
    p = jax.nn.softmax(s, axis=-1)
    attn = jnp.einsum("bhqk,bhkd->bhqd", p, v)
    attn = attn.transpose(0, 2, 1, 3).reshape(B, L, D)
    x1 = x + attn @ params["wc"]
    h2 = rms(x1, params["mlp_norm_w"])
    ff = jax.nn.silu(h2 @ params["w1"]) * (h2 @ params["w3"])
    return x1 + ff @ params["w2"]


if __name__ == "__main__":
    key = jax.random.PRNGKey(0)
    B, L, D, H = 2, 8, 32, 4          # batch, seq, d_model, n_heads
    dh = D // H
    d_ff = 4 * D                      # default d_ff
    eps = 1e-5
    std = 0.02                        # base_std

    keys = jax.random.split(key, 2)
    x = jax.random.normal(keys[0], (B, L, D), dtype=jnp.float32)

    def make_params(n_kv):
        ks = jax.random.split(keys[1], 9)
        return {
            "attn_norm_w": 1.0 + 0.05 * jax.random.normal(ks[0], (D,), jnp.float32),
            "mlp_norm_w": 1.0 + 0.05 * jax.random.normal(ks[1], (D,), jnp.float32),
            "wq": std * jax.random.normal(ks[2], (D, H * dh), jnp.float32),
            "wk": std * jax.random.normal(ks[3], (D, n_kv * dh), jnp.float32),
            "wv": std * jax.random.normal(ks[4], (D, n_kv * dh), jnp.float32),
            "wc": std * jax.random.normal(ks[5], (D, D), jnp.float32),
            "w1": std * jax.random.normal(ks[6], (D, d_ff), jnp.float32),
            "w3": std * jax.random.normal(ks[7], (D, d_ff), jnp.float32),
            "w2": std * jax.random.normal(ks[8], (d_ff, D), jnp.float32),
        }

    def run_case(n_kv, use_mup):
        raw = make_params(n_kv)
        prepped = prepare_params(raw)   # wqkv fused once, at init
        fn = jax.jit(functools.partial(decoder_layer, n_heads=H, n_kv_heads=n_kv,
                                       eps=eps, use_mup=use_mup))
        out, cache = fn(x, prepped)
        out = jax.block_until_ready(out)
        ref = decoder_layer_reference(x, raw, n_heads=H, n_kv_heads=n_kv,
                                      eps=eps, use_mup=use_mup)
        err = float(jnp.max(jnp.abs(out - ref)))
        assert jnp.allclose(out, ref, atol=1e-3, rtol=1e-3), \
            f"mismatch (n_kv={n_kv}, mup={use_mup}): max abs err {err}"
        assert cache is None

    run_case(n_kv=H, use_mup=False)        # default config (MHA, no mup)
    run_case(n_kv=H, use_mup=True)         # mup path (no norm-weight operand)
    run_case(n_kv=H // 2, use_mup=False)   # GQA path (shared KV via index slicing)

    print("KERNEL_OK")
</pallas_src>

<mosaic_0001>
module attributes {stable_mosaic.version = 11 : i64} {
  func.func @_matmul_residual_kernel(%arg0: i32, %arg1: i32, %arg2: memref<16x32xf32, #tpu.memory_space<vmem>>, %arg3: memref<32x32xf32, #tpu.memory_space<vmem>>, %arg4: memref<16x32xf32, #tpu.memory_space<vmem>>, %arg5: memref<16x32xf32, #tpu.memory_space<vmem>>) attributes {dimension_semantics = [#tpu.dimension_semantics<parallel>, #tpu.dimension_semantics<parallel>], iteration_bounds = array<i64: 1, 1>, scalar_prefetch = 0 : i64, scratch_operands = 0 : i64, tpu.core_type = #tpu.core_type<tc>, window_params = [{transform_indices = @transform_0, window_bounds = array<i64: 16, 32>}, {transform_indices = @transform_1, window_bounds = array<i64: 32, 32>}, {transform_indices = @transform_2, window_bounds = array<i64: 16, 32>}, {transform_indices = @transform_3, window_bounds = array<i64: 16, 32>}]} {
    %c0 = arith.constant 0 : index
    %c0_0 = arith.constant 0 : index
    %0 = vector.load %arg2[%c0, %c0_0] : memref<16x32xf32, #tpu.memory_space<vmem>>, vector<16x32xf32>
    %c0_1 = arith.constant 0 : index
    %c0_2 = arith.constant 0 : index
    %1 = vector.load %arg3[%c0_1, %c0_2] : memref<32x32xf32, #tpu.memory_space<vmem>>, vector<32x32xf32>
    %cst = arith.constant dense<0.000000e+00> : vector<16x32xf32>
    %2 = tpu.matmul %0, %1, %cst {dimension_numbers = #tpu.dot_dimension_numbers<[1], [0], [0], [1], [0, 0, 1, 1], [], []>} : vector<16x32xf32>, vector<32x32xf32>, vector<16x32xf32> -> vector<16x32xf32>
    %c0_3 = arith.constant 0 : index
    %c0_4 = arith.constant 0 : index
    %3 = vector.load %arg4[%c0_3, %c0_4] : memref<16x32xf32, #tpu.memory_space<vmem>>, vector<16x32xf32>
    %4 = arith.addf %3, %2 : vector<16x32xf32>
    %c0_5 = arith.constant 0 : index
    %c0_6 = arith.constant 0 : index
    %5 = vector.load %arg5[%c0_5, %c0_6] : memref<16x32xf32, #tpu.memory_space<vmem>>, vector<16x32xf32>
    tpu.vector_store %arg5[%c0_5, %c0_6], %4 {strides = array<i32>} : memref<16x32xf32, #tpu.memory_space<vmem>>, vector<16x32xf32>,
    return
  }
  func.func @transform_0(%arg0: i32, %arg1: i32) -> (i32, i32) {
    %c0_i32 = arith.constant 0 : i32
    %c0_i32_0 = arith.constant 0 : i32
    return %arg0, %c0_i32 : i32, i32
  }
  func.func @transform_1(%arg0: i32, %arg1: i32) -> (i32, i32) {
    %c0_i32 = arith.constant 0 : i32
    %c0_i32_0 = arith.constant 0 : i32
    return %c0_i32, %arg1 : i32, i32
  }
  func.func @transform_2(%arg0: i32, %arg1: i32) -> (i32, i32) {
    %c0_i32 = arith.constant 0 : i32
    return %arg0, %arg1 : i32, i32
  }
  func.func @transform_3(%arg0: i32, %arg1: i32) -> (i32, i32) {
    %c0_i32 = arith.constant 0 : i32
    return %arg0, %arg1 : i32, i32
  }
}

module attributes {stable_mosaic.version = 11 : i64} {
  func.func @_norm_matmul_kernel(%arg0: i32, %arg1: i32, %arg2: memref<16x32xf32, #tpu.memory_space<vmem>>, %arg3: memref<1x32xf32, #tpu.memory_space<vmem>>, %arg4: memref<32x96xf32, #tpu.memory_space<vmem>>, %arg5: memref<16x96xf32, #tpu.memory_space<vmem>>) attributes {dimension_semantics = [#tpu.dimension_semantics<parallel>, #tpu.dimension_semantics<parallel>], iteration_bounds = array<i64: 1, 1>, scalar_prefetch = 0 : i64, scratch_operands = 0 : i64, tpu.core_type = #tpu.core_type<tc>, window_params = [{transform_indices = @transform_0, window_bounds = array<i64: 16, 32>}, {pipeline_mode = #tpu.pipeline_mode<synchronous>, transform_indices = @transform_1, window_bounds = array<i64: 1, 32>}, {transform_indices = @transform_2, window_bounds = array<i64: 32, 96>}, {transform_indices = @transform_3, window_bounds = array<i64: 16, 96>}]} {
    %c0 = arith.constant 0 : index
    %c0_0 = arith.constant 0 : index
    %0 = vector.load %arg2[%c0, %c0_0] : memref<16x32xf32, #tpu.memory_space<vmem>>, vector<16x32xf32>
    %1 = arith.mulf %0, %0 : vector<16x32xf32>
    %cst = arith.constant dense<0.000000e+00> : vector<16xf32>
    %2 = vector.multi_reduction <add>, %1, %cst [1] : vector<16x32xf32> to vector<16xf32>
    %3 = vector.shape_cast %2 : vector<16xf32> to vector<16x1xf32>
    %cst_1 = arith.constant 3.125000e-02 : f32
    %4 = vector.broadcast %cst_1 : f32 to vector<16x1xf32>
    %5 = arith.mulf %3, %4 : vector<16x1xf32>
    %cst_2 = arith.constant 9.99999974E-6 : f32
    %6 = vector.broadcast %cst_2 : f32 to vector<16x1xf32>
    %7 = arith.addf %5, %6 : vector<16x1xf32>
    %8 = math.rsqrt %7 : vector<16x1xf32>
    %9 = vector.broadcast %8 : vector<16x1xf32> to vector<16x32xf32>
    %10 = arith.mulf %0, %9 : vector<16x32xf32>
    %c0_3 = arith.constant 0 : index
    %c0_4 = arith.constant 0 : index
    %11 = vector.load %arg3[%c0_3, %c0_4] : memref<1x32xf32, #tpu.memory_space<vmem>>, vector<1x32xf32>
    %12 = vector.broadcast %11 : vector<1x32xf32> to vector<16x32xf32>
    %13 = arith.mulf %10, %12 : vector<16x32xf32>
    %c0_5 = arith.constant 0 : index
    %c0_6 = arith.constant 0 : index
    %14 = vector.load %arg4[%c0_5, %c0_6] : memref<32x96xf32, #tpu.memory_space<vmem>>, vector<32x96xf32>
    %cst_7 = arith.constant dense<0.000000e+00> : vector<16x96xf32>
    %15 = tpu.matmul %13, %14, %cst_7 {dimension_numbers = #tpu.dot_dimension_numbers<[1], [0], [0], [1], [0, 0, 1, 1], [], []>} : vector<16x32xf32>, vector<32x96xf32>, vector<16x96xf32> -> vector<16x96xf32>
    %c0_8 = arith.constant 0 : index
    %c0_9 = arith.constant 0 : index
    %16 = vector.load %arg5[%c0_8, %c0_9] : memref<16x96xf32, #tpu.memory_space<vmem>>, vector<16x96xf32>
    tpu.vector_store %arg5[%c0_8, %c0_9], %15 {strides = array<i32>} : memref<16x96xf32, #tpu.memory_space<vmem>>, vector<16x96xf32>,
    return
  }
  func.func @transform_0(%arg0: i32, %arg1: i32) -> (i32, i32) {
    %c0_i32 = arith.constant 0 : i32
    %c0_i32_0 = arith.constant 0 : i32
    return %arg0, %c0_i32 : i32, i32
  }
  func.func @transform_1(%arg0: i32, %arg1: i32) -> (i32, i32) {
    %c0_i32 = arith.constant 0 : i32
    %c0_i32_0 = arith.constant 0 : i32
    %c0_i32_1 = arith.constant 0 : i32
    return %c0_i32, %c0_i32_0 : i32, i32
  }
  func.func @transform_2(%arg0: i32, %arg1: i32) -> (i32, i32) {
    %c0_i32 = arith.constant 0 : i32
    %c0_i32_0 = arith.constant 0 : i32
    return %c0_i32, %arg1 : i32, i32
  }
  func.func @transform_3(%arg0: i32, %arg1: i32) -> (i32, i32) {
    %c0_i32 = arith.constant 0 : i32
    return %arg0, %arg1 : i32, i32
  }
}

module attributes {stable_mosaic.version = 11 : i64} {
  func.func @_flash_attention_kernel(%arg0: i32, %arg1: i32, %arg2: i32, %arg3: memref<8x32xf32, #tpu.memory_space<vmem>>, %arg4: memref<8x32xf32, #tpu.memory_space<vmem>>, %arg5: memref<8x32xf32, #tpu.memory_space<vmem>>, %arg6: memref<8x32xf32, #tpu.memory_space<vmem>>, %arg7: memref<4x8x1xf32, #tpu.memory_space<vmem>>, %arg8: memref<4x8x1xf32, #tpu.memory_space<vmem>>, %arg9: memref<4x8x8xf32, #tpu.memory_space<vmem>>) attributes {dimension_semantics = [#tpu.dimension_semantics<parallel>, #tpu.dimension_semantics<parallel>, #tpu.dimension_semantics<arbitrary>], iteration_bounds = array<i64: 2, 1, 1>, scalar_prefetch = 0 : i64, scratch_operands = 3 : i64, tpu.core_type = #tpu.core_type<tc>, window_params = [{transform_indices = @transform_0, window_bounds = array<i64: 8, 32>}, {transform_indices = @transform_1, window_bounds = array<i64: 8, 32>}, {transform_indices = @transform_2, window_bounds = array<i64: 8, 32>}, {transform_indices = @transform_3, window_bounds = array<i64: 8, 32>}]} {
    %c0_i32 = arith.constant 0 : i32
    %0 = arith.cmpi eq, %arg2, %c0_i32 : i32
    %1 = arith.extui %0 : i1 to i32
    %c0_i32_0 = arith.constant 0 : i32
    %2 = arith.cmpi ne, %1, %c0_i32_0 : i32
    scf.if %2 {
      %cst = arith.constant 0xFF800000 : f32
      %12 = vector.broadcast %cst : f32 to vector<4x8x1xf32>
      %c0 = arith.constant 0 : index
      %c0_5 = arith.constant 0 : index
      %c0_6 = arith.constant 0 : index
      %13 = vector.load %arg7[%c0, %c0_5, %c0_6] : memref<4x8x1xf32, #tpu.memory_space<vmem>>, vector<4x8x1xf32>
      tpu.vector_store %arg7[%c0, %c0_5, %c0_6], %12 {strides = array<i32>} : memref<4x8x1xf32, #tpu.memory_space<vmem>>, vector<4x8x1xf32>,
      %cst_7 = arith.constant 0.000000e+00 : f32
      %14 = vector.broadcast %cst_7 : f32 to vector<4x8x1xf32>
      %c0_8 = arith.constant 0 : index
      %c0_9 = arith.constant 0 : index
      %c0_10 = arith.constant 0 : index
      %15 = vector.load %arg8[%c0_8, %c0_9, %c0_10] : memref<4x8x1xf32, #tpu.memory_space<vmem>>, vector<4x8x1xf32>
      tpu.vector_store %arg8[%c0_8, %c0_9, %c0_10], %14 {strides = array<i32>} : memref<4x8x1xf32, #tpu.memory_space<vmem>>, vector<4x8x1xf32>,
      %cst_11 = arith.constant 0.000000e+00 : f32
      %16 = vector.broadcast %cst_11 : f32 to vector<4x8x8xf32>
      %c0_12 = arith.constant 0 : index
      %c0_13 = arith.constant 0 : index
      %c0_14 = arith.constant 0 : index
      %17 = vector.load %arg9[%c0_12, %c0_13, %c0_14] : memref<4x8x8xf32, #tpu.memory_space<vmem>>, vector<4x8x8xf32>
      tpu.vector_store %arg9[%c0_12, %c0_13, %c0_14], %16 {strides = array<i32>} : memref<4x8x8xf32, #tpu.memory_space<vmem>>, vector<4x8x8xf32>,
    } else {
    }
    %c8_i32 = arith.constant 8 : i32
    %3 = arith.muli %arg2, %c8_i32 : i32
    %c1_i32 = arith.constant 1 : i32
    %4 = arith.addi %arg1, %c1_i32 : i32
    %c8_i32_1 = arith.constant 8 : i32
    %5 = arith.muli %4, %c8_i32_1 : i32
    %6 = arith.cmpi slt, %3, %5 : i32
    %7 = arith.extui %6 : i1 to i32
    %c0_i32_2 = arith.constant 0 : i32
    %8 = arith.cmpi ne, %7, %c0_i32_2 : i32
    scf.if %8 {
      %c8_i32_5 = arith.constant 8 : i32
      %12 = arith.muli %arg1, %c8_i32_5 : i32
      %13 = tpu.iota {dimensions = array<i32: 0>} : vector<8x8xi32>
      %14 = vector.broadcast %12 : i32 to vector<8x8xi32>
      %15 = arith.addi %14, %13 : vector<8x8xi32>
      %c8_i32_6 = arith.constant 8 : i32
      %16 = arith.muli %arg2, %c8_i32_6 : i32
      %17 = tpu.iota {dimensions = array<i32: 1>} : vector<8x8xi32>
      %18 = vector.broadcast %16 : i32 to vector<8x8xi32>
      %19 = arith.addi %18, %17 : vector<8x8xi32>
      %20 = arith.cmpi sle, %19, %15 : vector<8x8xi32>
      %c0 = arith.constant 0 : index
      %c0_7 = arith.constant 0 : index
      %21 = vector.load %arg3[%c0, %c0_7] : memref<8x32xf32, #tpu.memory_space<vmem>>, vector<8x8xf32>
      %cst = arith.constant 0.353553385 : f32
      %22 = vector.broadcast %cst : f32 to vector<8x8xf32>
      %23 = arith.mulf %21, %22 : vector<8x8xf32>
      %c0_8 = arith.constant 0 : index
      %c0_9 = arith.constant 0 : index
      %24 = vector.load %arg4[%c0_8, %c0_9] : memref<8x32xf32, #tpu.memory_space<vmem>>, vector<8x8xf32>
      %c0_10 = arith.constant 0 : index
      %c0_11 = arith.constant 0 : index
      %25 = vector.load %arg5[%c0_10, %c0_11] : memref<8x32xf32, #tpu.memory_space<vmem>>, vector<8x8xf32>
      %cst_12 = arith.constant dense<0.000000e+00> : vector<8x8xf32>
      %26 = tpu.matmul %23, %24, %cst_12 {dimension_numbers = #tpu.dot_dimension_numbers<[1], [1], [0], [0], [0, 0, 1, 0], [], []>} : vector<8x8xf32>, vector<8x8xf32>, vector<8x8xf32> -> vector<8x8xf32>
      %cst_13 = arith.constant -1.000000e+30 : f32
      %27 = vector.broadcast %cst_13 : f32 to vector<8x8xf32>
      %28 = arith.select %20, %26, %27 : vector<8x8xi1>, vector<8x8xf32>
      %c0_14 = arith.constant 0 : index
      %c0_15 = arith.constant 0 : index
      %c0_16 = arith.constant 0 : index
      %29 = vector.load %arg7[%c0_14, %c0_15, %c0_16] : memref<4x8x1xf32, #tpu.memory_space<vmem>>, vector<1x8x1xf32>
      %30 = vector.shape_cast %29 : vector<1x8x1xf32> to vector<8x1xf32>
      %cst_17 = arith.constant dense<0xFF800000> : vector<8xf32>
      %31 = vector.multi_reduction <maximumf>, %28, %cst_17 [1] : vector<8x8xf32> to vector<8xf32>
      %32 = vector.shape_cast %31 : vector<8xf32> to vector<8x1xf32>
      %33 = arith.maximumf %30, %32 : vector<8x1xf32>
      %34 = arith.subf %30, %33 : vector<8x1xf32>
      %35 = math.exp %34 : vector<8x1xf32>
      %36 = vector.broadcast %33 : vector<8x1xf32> to vector<8x8xf32>
      %37 = arith.subf %28, %36 : vector<8x8xf32>
      %38 = math.exp %37 : vector<8x8xf32>
      %c0_18 = arith.constant 0 : index
      %c0_19 = arith.constant 0 : index
      %c0_20 = arith.constant 0 : index
      %39 = vector.load %arg8[%c0_18, %c0_19, %c0_20] : memref<4x8x1xf32, #tpu.memory_space<vmem>>, vector<1x8x1xf32>
      %40 = vector.shape_cast %39 : vector<1x8x1xf32> to vector<8x1xf32>
      %41 = arith.mulf %35, %40 : vector<8x1xf32>
      %cst_21 = arith.constant dense<0.000000e+00> : vector<8xf32>
      %42 = vector.multi_reduction <add>, %38, %cst_21 [1] : vector<8x8xf32> to vector<8xf32>
      %43 = vector.shape_cast %42 : vector<8xf32> to vector<8x1xf32>
      %44 = arith.addf %41, %43 : vector<8x1xf32>
      %c0_22 = arith.constant 0 : index
      %c0_23 = arith.constant 0 : index
      %c0_24 = arith.constant 0 : index
      %45 = vector.load %arg8[%c0_22, %c0_23, %c0_24] : memref<4x8x1xf32, #tpu.memory_space<vmem>>, vector<1x8x1xf32>
      %46 = vector.shape_cast %45 : vector<1x8x1xf32> to vector<8x1xf32>
      %47 = vector.shape_cast %44 : vector<8x1xf32> to vector<1x8x1xf32>
      tpu.vector_store %arg8[%c0_22, %c0_23, %c0_24], %47 {strides = array<i32>} : memref<4x8x1xf32, #tpu.memory_space<vmem>>, vector<1x8x1xf32>,
      %cst_25 = arith.constant dense<0.000000e+00> : vector<8x8xf32>
      %48 = tpu.matmul %38, %25, %cst_25 {dimension_numbers = #tpu.dot_dimension_numbers<[1], [0], [0], [1], [0, 0, 1, 1], [], []>} : vector<8x8xf32>, vector<8x8xf32>, vector<8x8xf32> -> vector<8x8xf32>
      %c0_26 = arith.constant 0 : index
      %c0_27 = arith.constant 0 : index
      %c0_28 = arith.constant 0 : index
      %49 = vector.load %arg9[%c0_26, %c0_27, %c0_28] : memref<4x8x8xf32, #tpu.memory_space<vmem>>, vector<1x8x8xf32>
      %50 = vector.shape_cast %49 : vector<1x8x8xf32> to vector<8x8xf32>
      %51 = vector.broadcast %35 : vector<8x1xf32> to vector<8x8xf32>
      %52 = arith.mulf %51, %50 : vector<8x8xf32>
      %53 = arith.addf %52, %48 : vector<8x8xf32>
      %c0_29 = arith.constant 0 : index
      %c0_30 = arith.constant 0 : index
      %c0_31 = arith.constant 0 : index
      %54 = vector.load %arg9[%c0_29, %c0_30, %c0_31] : memref<4x8x8xf32, #tpu.memory_space<vmem>>, vector<1x8x8xf32>
      %55 = vector.shape_cast %54 : vector<1x8x8xf32> to vector<8x8xf32>
      %56 = vector.shape_cast %53 : vector<8x8xf32> to vector<1x8x8xf32>
      tpu.vector_store %arg9[%c0_29, %c0_30, %c0_31], %56 {strides = array<i32>} : memref<4x8x8xf32, #tpu.memory_space<vmem>>, vector<1x8x8xf32>,
      %c0_32 = arith.constant 0 : index
      %c0_33 = arith.constant 0 : index
      %c0_34 = arith.constant 0 : index
      %57 = vector.load %arg7[%c0_32, %c0_33, %c0_34] : memref<4x8x1xf32, #tpu.memory_space<vmem>>, vector<1x8x1xf32>
      %58 = vector.shape_cast %57 : vector<1x8x1xf32> to vector<8x1xf32>
      %59 = vector.shape_cast %33 : vector<8x1xf32> to vector<1x8x1xf32>
      tpu.vector_store %arg7[%c0_32, %c0_33, %c0_34], %59 {strides = array<i32>} : memref<4x8x1xf32, #tpu.memory_space<vmem>>, vector<1x8x1xf32>,
      %c0_35 = arith.constant 0 : index
      %c8 = arith.constant 8 : index
      %60 = vector.load %arg3[%c0_35, %c8] : memref<8x32xf32, #tpu.memory_space<vmem>>, vector<8x8xf32>
      %cst_36 = arith.constant 0.353553385 : f32
      %61 = vector.broadcast %cst_36 : f32 to vector<8x8xf32>
      %62 = arith.mulf %60, %61 : vector<8x8xf32>
      %c0_37 = arith.constant 0 : index
      %c8_38 = arith.constant 8 : index
      %63 = vector.load %arg4[%c0_37, %c8_38] : memref<8x32xf32, #tpu.memory_space<vmem>>, vector<8x8xf32>
      %c0_39 = arith.constant 0 : index
      %c8_40 = arith.constant 8 : index
      %64 = vector.load %arg5[%c0_39, %c8_40] : memref<8x32xf32, #tpu.memory_space<vmem>>, vector<8x8xf32>
      %cst_41 = arith.constant dense<0.000000e+00> : vector<8x8xf32>
      %65 = tpu.matmul %62, %63, %cst_41 {dimension_numbers = #tpu.dot_dimension_numbers<[1], [1], [0], [0], [0, 0, 1, 0], [], []>} : vector<8x8xf32>, vector<8x8xf32>, vector<8x8xf32> -> vector<8x8xf32>
      %cst_42 = arith.constant -1.000000e+30 : f32
      %66 = vector.broadcast %cst_42 : f32 to vector<8x8xf32>
      %67 = arith.select %20, %65, %66 : vector<8x8xi1>, vector<8x8xf32>
      %c1 = arith.constant 1 : index
      %c0_43 = arith.constant 0 : index
      %c0_44 = arith.constant 0 : index
      %68 = vector.load %arg7[%c1, %c0_43, %c0_44] : memref<4x8x1xf32, #tpu.memory_space<vmem>>, vector<1x8x1xf32>
      %69 = vector.shape_cast %68 : vector<1x8x1xf32> to vector<8x1xf32>
      %cst_45 = arith.constant dense<0xFF800000> : vector<8xf32>
      %70 = vector.multi_reduction <maximumf>, %67, %cst_45 [1] : vector<8x8xf32> to vector<8xf32>
      %71 = vector.shape_cast %70 : vector<8xf32> to vector<8x1xf32>
      %72 = arith.maximumf %69, %71 : vector<8x1xf32>
      %73 = arith.subf %69, %72 : vector<8x1xf32>
      %74 = math.exp %73 : vector<8x1xf32>
      %75 = vector.broadcast %72 : vector<8x1xf32> to vector<8x8xf32>
      %76 = arith.subf %67, %75 : vector<8x8xf32>
      %77 = math.exp %76 : vector<8x8xf32>
      %c1_46 = arith.constant 1 : index
      %c0_47 = arith.constant 0 : index
      %c0_48 = arith.constant 0 : index
      %78 = vector.load %arg8[%c1_46, %c0_47, %c0_48] : memref<4x8x1xf32, #tpu.memory_space<vmem>>, vector<1x8x1xf32>
      %79 = vector.shape_cast %78 : vector<1x8x1xf32> to vector<8x1xf32>
      %80 = arith.mulf %74, %79 : vector<8x1xf32>
      %cst_49 = arith.constant dense<0.000000e+00> : vector<8xf32>
      %81 = vector.multi_reduction <add>, %77, %cst_49 [1] : vector<8x8xf32> to vector<8xf32>
      %82 = vector.shape_cast %81 : vector<8xf32> to vector<8x1xf32>
      %83 = arith.addf %80, %82 : vector<8x1xf32>
      %c1_50 = arith.constant 1 : index
      %c0_51 = arith.constant 0 : index
      %c0_52 = arith.constant 0 : index
      %84 = vector.load %arg8[%c1_50, %c0_51, %c0_52] : memref<4x8x1xf32, #tpu.memory_space<vmem>>, vector<1x8x1xf32>
      %85 = vector.shape_cast %84 : vector<1x8x1xf32> to vector<8x1xf32>
      %86 = vector.shape_cast %83 : vector<8x1xf32> to vector<1x8x1xf32>
      tpu.vector_store %arg8[%c1_50, %c0_51, %c0_52], %86 {strides = array<i32>} : memref<4x8x1xf32, #tpu.memory_space<vmem>>, vector<1x8x1xf32>,
      %cst_53 = arith.constant dense<0.000000e+00> : vector<8x8xf32>
      %87 = tpu.matmul %77, %64, %cst_53 {dimension_numbers = #tpu.dot_dimension_numbers<[1], [0], [0], [1], [0, 0, 1, 1], [], []>} : vector<8x8xf32>, vector<8x8xf32>, vector<8x8xf32> -> vector<8x8xf32>
      %c1_54 = arith.constant 1 : index
      %c0_55 = arith.constant 0 : index
      %c0_56 = arith.constant 0 : index
      %88 = vector.load %arg9[%c1_54, %c0_55, %c0_56] : memref<4x8x8xf32, #tpu.memory_space<vmem>>, vector<1x8x8xf32>
      %89 = vector.shape_cast %88 : vector<1x8x8xf32> to vector<8x8xf32>
      %90 = vector.broadcast %74 : vector<8x1xf32> to vector<8x8xf32>
      %91 = arith.mulf %90, %89 : vector<8x8xf32>
      %92 = arith.addf %91, %87 : vector<8x8xf32>
      %c1_57 = arith.constant 1 : index
      %c0_58 = arith.constant 0 : index
      %c0_59 = arith.constant 0 : index
      %93 = vector.load %arg9[%c1_57, %c0_58, %c0_59] : memref<4x8x8xf32, #tpu.memory_space<vmem>>, vector<1x8x8xf32>
      %94 = vector.shape_cast %93 : vector<1x8x8xf32> to vector<8x8xf32>
      %95 = vector.shape_cast %92 : vector<8x8xf32> to vector<1x8x8xf32>
      tpu.vector_store %arg9[%c1_57, %c0_58, %c0_59], %95 {strides = array<i32>} : memref<4x8x8xf32, #tpu.memory_space<vmem>>, vector<1x8x8xf32>,
      %c1_60 = arith.constant 1 : index
      %c0_61 = arith.constant 0 : index
      %c0_62 = arith.constant 0 : index
      %96 = vector.load %arg7[%c1_60, %c0_61, %c0_62] : memref<4x8x1xf32, #tpu.memory_space<vmem>>, vector<1x8x1xf32>
      %97 = vector.shape_cast %96 : vector<1x8x1xf32> to vector<8x1xf32>
      %98 = vector.shape_cast %72 : vector<8x1xf32> to vector<1x8x1xf32>
      tpu.vector_store %arg7[%c1_60, %c0_61, %c0_62], %98 {strides = array<i32>} : memref<4x8x1xf32, #tpu.memory_space<vmem>>, vector<1x8x1xf32>,
      %c0_63 = arith.constant 0 : index
      %c16 = arith.constant 16 : index
      %99 = vector.load %arg3[%c0_63, %c16] : memref<8x32xf32, #tpu.memory_space<vmem>>, vector<8x8xf32>
      %cst_64 = arith.constant 0.353553385 : f32
      %100 = vector.broadcast %cst_64 : f32 to vector<8x8xf32>
      %101 = arith.mulf %99, %100 : vector<8x8xf32>
      %c0_65 = arith.constant 0 : index
      %c16_66 = arith.constant 16 : index
      %102 = vector.load %arg4[%c0_65, %c16_66] : memref<8x32xf32, #tpu.memory_space<vmem>>, vector<8x8xf32>
      %c0_67 = arith.constant 0 : index
      %c16_68 = arith.constant 16 : index
      %103 = vector.load %arg5[%c0_67, %c16_68] : memref<8x32xf32, #tpu.memory_space<vmem>>, vector<8x8xf32>
      %cst_69 = arith.constant dense<0.000000e+00> : vector<8x8xf32>
      %104 = tpu.matmul %101, %102, %cst_69 {dimension_numbers = #tpu.dot_dimension_numbers<[1], [1], [0], [0], [0, 0, 1, 0], [], []>} : vector<8x8xf32>, vector<8x8xf32>, vector<8x8xf32> -> vector<8x8xf32>
      %cst_70 = arith.constant -1.000000e+30 : f32
      %105 = vector.broadcast %cst_70 : f32 to vector<8x8xf32>
      %106 = arith.select %20, %104, %105 : vector<8x8xi1>, vector<8x8xf32>
      %c2 = arith.constant 2 : index
      %c0_71 = arith.constant 0 : index
      %c0_72 = arith.constant 0 : index
      %107 = vector.load %arg7[%c2, %c0_71, %c0_72] : memref<4x8x1xf32, #tpu.memory_space<vmem>>, vector<1x8x1xf32>
      %108 = vector.shape_cast %107 : vector<1x8x1xf32> to vector<8x1xf32>
      %cst_73 = arith.constant dense<0xFF800000> : vector<8xf32>
      %109 = vector.multi_reduction <maximumf>, %106, %cst_73 [1] : vector<8x8xf32> to vector<8xf32>
      %110 = vector.shape_cast %109 : vector<8xf32> to vector<8x1xf32>
      %111 = arith.maximumf %108, %110 : vector<8x1xf32>
      %112 = arith.subf %108, %111 : vector<8x1xf32>
      %113 = math.exp %112 : vector<8x1xf32>
      %114 = vector.broadcast %111 : vector<8x1xf32> to vector<8x8xf32>
      %115 = arith.subf %106, %114 : vector<8x8xf32>
      %116 = math.exp %115 : vector<8x8xf32>
      %c2_74 = arith.constant 2 : index
      %c0_75 = arith.constant 0 : index
      %c0_76 = arith.constant 0 : index
      %117 = vector.load %arg8[%c2_74, %c0_75, %c0_76] : memref<4x8x1xf32, #tpu.memory_space<vmem>>, vector<1x8x1xf32>
      %118 = vector.shape_cast %117 : vector<1x8x1xf32> to vector<8x1xf32>
      %119 = arith.mulf %113, %118 : vector<8x1xf32>
      %cst_77 = arith.constant dense<0.000000e+00> : vector<8xf32>
      %120 = vector.multi_reduction <add>, %116, %cst_77 [1] : vector<8x8xf32> to vector<8xf32>
      %121 = vector.shape_cast %120 : vector<8xf32> to vector<8x1xf32>
      %122 = arith.addf %119, %121 : vector<8x1xf32>
      %c2_78 = arith.constant 2 : index
      %c0_79 = arith.constant 0 : index
      %c0_80 = arith.constant 0 : index
      %123 = vector.load %arg8[%c2_78, %c0_79, %c0_80] : memref<4x8x1xf32, #tpu.memory_space<vmem>>, vector<1x8x1xf32>
      %124 = vector.shape_cast %123 : vector<1x8x1xf32> to vector<8x1xf32>
      %125 = vector.shape_cast %122 : vector<8x1xf32> to vector<1x8x1xf32>
      tpu.vector_store %arg8[%c2_78, %c0_79, %c0_80], %125 {strides = array<i32>} : memref<4x8x1xf32, #tpu.memory_space<vmem>>, vector<1x8x1xf32>,
      %cst_81 = arith.constant dense<0.000000e+00> : vector<8x8xf32>
      %126 = tpu.matmul %116, %103, %cst_81 {dimension_numbers = #tpu.dot_dimension_numbers<[1], [0], [0], [1], [0, 0, 1, 1], [], []>} : vector<8x8xf32>, vector<8x8xf32>, vector<8x8xf32> -> vector<8x8xf32>
      %c2_82 = arith.constant 2 : index
      %c0_83 = arith.constant 0 : index
      %c0_84 = arith.constant 0 : index
      %127 = vector.load %arg9[%c2_82, %c0_83, %c0_84] : memref<4x8x8xf32, #tpu.memory_space<vmem>>, vector<1x8x8xf32>
      %128 = vector.shape_cast %127 : vector<1x8x8xf32> to vector<8x8xf32>
      %129 = vector.broadcast %113 : vector<8x1xf32> to vector<8x8xf32>
      %130 = arith.mulf %129, %128 : vector<8x8xf32>
      %131 = arith.addf %130, %126 : vector<8x8xf32>
      %c2_85 = arith.constant 2 : index
      %c0_86 = arith.constant 0 : index
      %c0_87 = arith.constant 0 : index
      %132 = vector.load %arg9[%c2_85, %c0_86, %c0_87] : memref<4x8x8xf32, #tpu.memory_space<vmem>>, vector<1x8x8xf32>
      %133 = vector.shape_cast %132 : vector<1x8x8xf32> to vector<8x8xf32>
      %134 = vector.shape_cast %131 : vector<8x8xf32> to vector<1x8x8xf32>
      tpu.vector_store %arg9[%c2_85, %c0_86, %c0_87], %134 {strides = array<i32>} : memref<4x8x8xf32, #tpu.memory_space<vmem>>, vector<1x8x8xf32>,
      %c2_88 = arith.constant 2 : index
      %c0_89 = arith.constant 0 : index
      %c0_90 = arith.constant 0 : index
      %135 = vector.load %arg7[%c2_88, %c0_89, %c0_90] : memref<4x8x1xf32, #tpu.memory_space<vmem>>, vector<1x8x1xf32>
      %136 = vector.shape_cast %135 : vector<1x8x1xf32> to vector<8x1xf32>
      %137 = vector.shape_cast %111 : vector<8x1xf32> to vector<1x8x1xf32>
      tpu.vector_store %arg7[%c2_88, %c0_89, %c0_90], %137 {strides = array<i32>} : memref<4x8x1xf32, #tpu.memory_space<vmem>>, vector<1x8x1xf32>,
      %c0_91 = arith.constant 0 : index
      %c24 = arith.constant 24 : index
      %138 = vector.load %arg3[%c0_91, %c24] : memref<8x32xf32, #tpu.memory_space<vmem>>, vector<8x8xf32>
      %cst_92 = arith.constant 0.353553385 : f32
      %139 = vector.broadcast %cst_92 : f32 to vector<8x8xf32>
      %140 = arith.mulf %138, %139 : vector<8x8xf32>
      %c0_93 = arith.constant 0 : index
      %c24_94 = arith.constant 24 : index
      %141 = vector.load %arg4[%c0_93, %c24_94] : memref<8x32xf32, #tpu.memory_space<vmem>>, vector<8x8xf32>
      %c0_95 = arith.constant 0 : index
      %c24_96 = arith.constant 24 : index
      %142 = vector.load %arg5[%c0_95, %c24_96] : memref<8x32xf32, #tpu.memory_space<vmem>>, vector<8x8xf32>
      %cst_97 = arith.constant dense<0.000000e+00> : vector<8x8xf32>
      %143 = tpu.matmul %140, %141, %cst_97 {dimension_numbers = #tpu.dot_dimension_numbers<[1], [1], [0], [0], [0, 0, 1, 0], [], []>} : vector<8x8xf32>, vector<8x8xf32>, vector<8x8xf32> -> vector<8x8xf32>
      %cst_98 = arith.constant -1.000000e+30 : f32
      %144 = vector.broadcast %cst_98 : f32 to vector<8x8xf32>
      %145 = arith.select %20, %143, %144 : vector<8x8xi1>, vector<8x8xf32>
      %c3 = arith.constant 3 : index
      %c0_99 = arith.constant 0 : index
      %c0_100 = arith.constant 0 : index
      %146 = vector.load %arg7[%c3, %c0_99, %c0_100] : memref<4x8x1xf32, #tpu.memory_space<vmem>>, vector<1x8x1xf32>
      %147 = vector.shape_cast %146 : vector<1x8x1xf32> to vector<8x1xf32>
      %cst_101 = arith.constant dense<0xFF800000> : vector<8xf32>
      %148 = vector.multi_reduction <maximumf>, %145, %cst_101 [1] : vector<8x8xf32> to vector<8xf32>
      %149 = vector.shape_cast %148 : vector<8xf32> to vector<8x1xf32>
      %150 = arith.maximumf %147, %149 : vector<8x1xf32>
      %151 = arith.subf %147, %150 : vector<8x1xf32>
      %152 = math.exp %151 : vector<8x1xf32>
      %153 = vector.broadcast %150 : vector<8x1xf32> to vector<8x8xf32>
      %154 = arith.subf %145, %153 : vector<8x8xf32>
      %155 = math.exp %154 : vector<8x8xf32>
      %c3_102 = arith.constant 3 : index
      %c0_103 = arith.constant 0 : index
      %c0_104 = arith.constant 0 : index
      %156 = vector.load %arg8[%c3_102, %c0_103, %c0_104] : memref<4x8x1xf32, #tpu.memory_space<vmem>>, vector<1x8x1xf32>
      %157 = vector.shape_cast %156 : vector<1x8x1xf32> to vector<8x1xf32>
      %158 = arith.mulf %152, %157 : vector<8x1xf32>
      %cst_105 = arith.constant dense<0.000000e+00> : vector<8xf32>
      %159 = vector.multi_reduction <add>, %155, %cst_105 [1] : vector<8x8xf32> to vector<8xf32>
      %160 = vector.shape_cast %159 : vector<8xf32> to vector<8x1xf32>
      %161 = arith.addf %158, %160 : vector<8x1xf32>
      %c3_106 = arith.constant 3 : index
      %c0_107 = arith.constant 0 : index
      %c0_108 = arith.constant 0 : index
      %162 = vector.load %arg8[%c3_106, %c0_107, %c0_108] : memref<4x8x1xf32, #tpu.memory_space<vmem>>, vector<1x8x1xf32>
      %163 = vector.shape_cast %162 : vector<1x8x1xf32> to vector<8x1xf32>
      %164 = vector.shape_cast %161 : vector<8x1xf32> to vector<1x8x1xf32>
      tpu.vector_store %arg8[%c3_106, %c0_107, %c0_108], %164 {strides = array<i32>} : memref<4x8x1xf32, #tpu.memory_space<vmem>>, vector<1x8x1xf32>,
      %cst_109 = arith.constant dense<0.000000e+00> : vector<8x8xf32>
      %165 = tpu.matmul %155, %142, %cst_109 {dimension_numbers = #tpu.dot_dimension_numbers<[1], [0], [0], [1], [0, 0, 1, 1], [], []>} : vector<8x8xf32>, vector<8x8xf32>, vector<8x8xf32> -> vector<8x8xf32>
      %c3_110 = arith.constant 3 : index
      %c0_111 = arith.constant 0 : index
      %c0_112 = arith.constant 0 : index
      %166 = vector.load %arg9[%c3_110, %c0_111, %c0_112] : memref<4x8x8xf32, #tpu.memory_space<vmem>>, vector<1x8x8xf32>
      %167 = vector.shape_cast %166 : vector<1x8x8xf32> to vector<8x8xf32>
      %168 = vector.broadcast %152 : vector<8x1xf32> to vector<8x8xf32>
      %169 = arith.mulf %168, %167 : vector<8x8xf32>
      %170 = arith.addf %169, %165 : vector<8x8xf32>
      %c3_113 = arith.constant 3 : index
      %c0_114 = arith.constant 0 : index
      %c0_115 = arith.constant 0 : index
      %171 = vector.load %arg9[%c3_113, %c0_114, %c0_115] : memref<4x8x8xf32, #tpu.memory_space<vmem>>, vector<1x8x8xf32>
      %172 = vector.shape_cast %171 : vector<1x8x8xf32> to vector<8x8xf32>
      %173 = vector.shape_cast %170 : vector<8x8xf32> to vector<1x8x8xf32>
      tpu.vector_store %arg9[%c3_113, %c0_114, %c0_115], %173 {strides = array<i32>} : memref<4x8x8xf32, #tpu.memory_space<vmem>>, vector<1x8x8xf32>,
      %c3_116 = arith.constant 3 : index
      %c0_117 = arith.constant 0 : index
      %c0_118 = arith.constant 0 : index
      %174 = vector.load %arg7[%c3_116, %c0_117, %c0_118] : memref<4x8x1xf32, #tpu.memory_space<vmem>>, vector<1x8x1xf32>
      %175 = vector.shape_cast %174 : vector<1x8x1xf32> to vector<8x1xf32>
      %176 = vector.shape_cast %150 : vector<8x1xf32> to vector<1x8x1xf32>
      tpu.vector_store %arg7[%c3_116, %c0_117, %c0_118], %176 {strides = array<i32>} : memref<4x8x1xf32, #tpu.memory_space<vmem>>, vector<1x8x1xf32>,
    } else {
    }
    %c0_i32_3 = arith.constant 0 : i32
    %9 = arith.cmpi eq, %arg2, %c0_i32_3 : i32
    %10 = arith.extui %9 : i1 to i32
    %c0_i32_4 = arith.constant 0 : i32
    %11 = arith.cmpi ne, %10, %c0_i32_4 : i32
    scf.if %11 {
      %c0 = arith.constant 0 : index
      %c0_5 = arith.constant 0 : index
      %c0_6 = arith.constant 0 : index
      %12 = vector.load %arg8[%c0, %c0_5, %c0_6] : memref<4x8x1xf32, #tpu.memory_space<vmem>>, vector<1x8x1xf32>
      %13 = vector.shape_cast %12 : vector<1x8x1xf32> to vector<8x1xf32>
      %14 = tpu.reciprocal %13 {approx = true} : vector<8x1xf32> -> vector<8x1xf32>
      %c0_7 = arith.constant 0 : index
      %c0_8 = arith.constant 0 : index
      %c0_9 = arith.constant 0 : index
      %15 = vector.load %arg9[%c0_7, %c0_8, %c0_9] : memref<4x8x8xf32, #tpu.memory_space<vmem>>, vector<1x8x8xf32>
      %16 = vector.shape_cast %15 : vector<1x8x8xf32> to vector<8x8xf32>
      %17 = vector.broadcast %14 : vector<8x1xf32> to vector<8x8xf32>
      %18 = arith.mulf %16, %17 : vector<8x8xf32>
      %c0_10 = arith.constant 0 : index
      %c0_11 = arith.constant 0 : index
      %19 = vector.load %arg6[%c0_10, %c0_11] : memref<8x32xf32, #tpu.memory_space<vmem>>, vector<8x8xf32>
      tpu.vector_store %arg6[%c0_10, %c0_11], %18 {strides = array<i32>} : memref<8x32xf32, #tpu.memory_space<vmem>>, vector<8x8xf32>,
      %c1 = arith.constant 1 : index
      %c0_12 = arith.constant 0 : index
      %c0_13 = arith.constant 0 : index
      %20 = vector.load %arg8[%c1, %c0_12, %c0_13] : memref<4x8x1xf32, #tpu.memory_space<vmem>>, vector<1x8x1xf32>
      %21 = vector.shape_cast %20 : vector<1x8x1xf32> to vector<8x1xf32>
      %22 = tpu.reciprocal %21 {approx = true} : vector<8x1xf32> -> vector<8x1xf32>
      %c1_14 = arith.constant 1 : index
      %c0_15 = arith.constant 0 : index
      %c0_16 = arith.constant 0 : index
      %23 = vector.load %arg9[%c1_14, %c0_15, %c0_16] : memref<4x8x8xf32, #tpu.memory_space<vmem>>, vector<1x8x8xf32>
      %24 = vector.shape_cast %23 : vector<1x8x8xf32> to vector<8x8xf32>
      %25 = vector.broadcast %22 : vector<8x1xf32> to vector<8x8xf32>
      %26 = arith.mulf %24, %25 : vector<8x8xf32>
      %c0_17 = arith.constant 0 : index
      %c8 = arith.constant 8 : index
      %27 = vector.load %arg6[%c0_17, %c8] : memref<8x32xf32, #tpu.memory_space<vmem>>, vector<8x8xf32>
      tpu.vector_store %arg6[%c0_17, %c8], %26 {strides = array<i32>} : memref<8x32xf32, #tpu.memory_space<vmem>>, vector<8x8xf32>,
      %c2 = arith.constant 2 : index
      %c0_18 = arith.constant 0 : index
      %c0_19 = arith.constant 0 : index
      %28 = vector.load %arg8[%c2, %c0_18, %c0_19] : memref<4x8x1xf32, #tpu.memory_space<vmem>>, vector<1x8x1xf32>
      %29 = vector.shape_cast %28 : vector<1x8x1xf32> to vector<8x1xf32>
      %30 = tpu.reciprocal %29 {approx = true} : vector<8x1xf32> -> vector<8x1xf32>
      %c2_20 = arith.constant 2 : index
      %c0_21 = arith.constant 0 : index
      %c0_22 = arith.constant 0 : index
      %31 = vector.load %arg9[%c2_20, %c0_21, %c0_22] : memref<4x8x8xf32, #tpu.memory_space<vmem>>, vector<1x8x8xf32>
      %32 = vector.shape_cast %31 : vector<1x8x8xf32> to vector<8x8xf32>
      %33 = vector.broadcast %30 : vector<8x1xf32> to vector<8x8xf32>
      %34 = arith.mulf %32, %33 : vector<8x8xf32>
      %c0_23 = arith.constant 0 : index
      %c16 = arith.constant 16 : index
      %35 = vector.load %arg6[%c0_23, %c16] : memref<8x32xf32, #tpu.memory_space<vmem>>, vector<8x8xf32>
      tpu.vector_store %arg6[%c0_23, %c16], %34 {strides = array<i32>} : memref<8x32xf32, #tpu.memory_space<vmem>>, vector<8x8xf32>,
      %c3 = arith.constant 3 : index
      %c0_24 = arith.constant 0 : index
      %c0_25 = arith.constant 0 : index
      %36 = vector.load %arg8[%c3, %c0_24, %c0_25] : memref<4x8x1xf32, #tpu.memory_space<vmem>>, vector<1x8x1xf32>
      %37 = vector.shape_cast %36 : vector<1x8x1xf32> to vector<8x1xf32>
      %38 = tpu.reciprocal %37 {approx = true} : vector<8x1xf32> -> vector<8x1xf32>
      %c3_26 = arith.constant 3 : index
      %c0_27 = arith.constant 0 : index
      %c0_28 = arith.constant 0 : index
      %39 = vector.load %arg9[%c3_26, %c0_27, %c0_28] : memref<4x8x8xf32, #tpu.memory_space<vmem>>, vector<1x8x8xf32>
      %40 = vector.shape_cast %39 : vector<1x8x8xf32> to vector<8x8xf32>
      %41 = vector.broadcast %38 : vector<8x1xf32> to vector<8x8xf32>
      %42 = arith.mulf %40, %41 : vector<8x8xf32>
      %c0_29 = arith.constant 0 : index
      %c24 = arith.constant 24 : index
      %43 = vector.load %arg6[%c0_29, %c24] : memref<8x32xf32, #tpu.memory_space<vmem>>, vector<8x8xf32>
      tpu.vector_store %arg6[%c0_29, %c24], %42 {strides = array<i32>} : memref<8x32xf32, #tpu.memory_space<vmem>>, vector<8x8xf32>,
    } else {
    }
    return
  }
  func.func @transform_0(%arg0: i32, %arg1: i32, %arg2: i32) -> (i32, i32) {
    %c1_i32 = arith.constant 1 : i32
    %0 = arith.muli %arg0, %c1_i32 : i32
    %1 = arith.addi %0, %arg1 : i32
    %c0_i32 = arith.constant 0 : i32
    %c0_i32_0 = arith.constant 0 : i32
    return %1, %c0_i32 : i32, i32
  }
  func.func @transform_1(%arg0: i32, %arg1: i32, %arg2: i32) -> (i32, i32) {
    %c1_i32 = arith.constant 1 : i32
    %0 = arith.muli %arg0, %c1_i32 : i32
    %1 = arith.addi %0, %arg2 : i32
    %c0_i32 = arith.constant 0 : i32
    %c0_i32_0 = arith.constant 0 : i32
    return %1, %c0_i32 : i32, i32
  }
  func.func @transform_2(%arg0: i32, %arg1: i32, %arg2: i32) -> (i32, i32) {
    %c1_i32 = arith.constant 1 : i32
    %0 = arith.muli %arg0, %c1_i32 : i32
    %1 = arith.addi %0, %arg2 : i32
    %c0_i32 = arith.constant 0 : i32
    %c0_i32_0 = arith.constant 0 : i32
    return %1, %c0_i32 : i32, i32
  }
  func.func @transform_3(%arg0: i32, %arg1: i32, %arg2: i32) -> (i32, i32) {
    %c1_i32 = arith.constant 1 : i32
    %0 = arith.muli %arg0, %c1_i32 : i32
    %1 = arith.addi %0, %arg1 : i32
    %c0_i32 = arith.constant 0 : i32
    %c0_i32_0 = arith.constant 0 : i32
    return %1, %c0_i32 : i32, i32
  }
}

module attributes {stable_mosaic.version = 11 : i64} {
  func.func @_norm_mlp_residual_kernel(%arg0: i32, %arg1: i32, %arg2: memref<16x32xf32, #tpu.memory_space<vmem>>, %arg3: memref<1x32xf32, #tpu.memory_space<vmem>>, %arg4: memref<32x128xf32, #tpu.memory_space<vmem>>, %arg5: memref<32x128xf32, #tpu.memory_space<vmem>>, %arg6: memref<128x32xf32, #tpu.memory_space<vmem>>, %arg7: memref<16x32xf32, #tpu.memory_space<vmem>>, %arg8: memref<16x32xf32, #tpu.memory_space<vmem>>, %arg9: memref<16x32xf32, #tpu.memory_space<vmem>>) attributes {dimension_semantics = [#tpu.dimension_semantics<parallel>, #tpu.dimension_semantics<arbitrary>], iteration_bounds = array<i64: 1, 1>, scalar_prefetch = 0 : i64, scratch_operands = 2 : i64, tpu.core_type = #tpu.core_type<tc>, window_params = [{transform_indices = @transform_0, window_bounds = array<i64: 16, 32>}, {pipeline_mode = #tpu.pipeline_mode<synchronous>, transform_indices = @transform_1, window_bounds = array<i64: 1, 32>}, {transform_indices = @transform_2, window_bounds = array<i64: 32, 128>}, {transform_indices = @transform_3, window_bounds = array<i64: 32, 128>}, {transform_indices = @transform_4, window_bounds = array<i64: 128, 32>}, {transform_indices = @transform_5, window_bounds = array<i64: 16, 32>}]} {
    %c0_i32 = arith.constant 0 : i32
    %0 = arith.cmpi eq, %arg1, %c0_i32 : i32
    %1 = arith.extui %0 : i1 to i32
    %c0_i32_0 = arith.constant 0 : i32
    %2 = arith.cmpi ne, %1, %c0_i32_0 : i32
    scf.if %2 {
      %c0_17 = arith.constant 0 : index
      %c0_18 = arith.constant 0 : index
      %23 = vector.load %arg2[%c0_17, %c0_18] : memref<16x32xf32, #tpu.memory_space<vmem>>, vector<16x32xf32>
      %24 = arith.mulf %23, %23 : vector<16x32xf32>
      %cst_19 = arith.constant dense<0.000000e+00> : vector<16xf32>
      %25 = vector.multi_reduction <add>, %24, %cst_19 [1] : vector<16x32xf32> to vector<16xf32>
      %26 = vector.shape_cast %25 : vector<16xf32> to vector<16x1xf32>
      %cst_20 = arith.constant 3.125000e-02 : f32
      %27 = vector.broadcast %cst_20 : f32 to vector<16x1xf32>
      %28 = arith.mulf %26, %27 : vector<16x1xf32>
      %cst_21 = arith.constant 9.99999974E-6 : f32
      %29 = vector.broadcast %cst_21 : f32 to vector<16x1xf32>
      %30 = arith.addf %28, %29 : vector<16x1xf32>
      %31 = math.rsqrt %30 : vector<16x1xf32>
      %32 = vector.broadcast %31 : vector<16x1xf32> to vector<16x32xf32>
      %33 = arith.mulf %23, %32 : vector<16x32xf32>
      %c0_22 = arith.constant 0 : index
      %c0_23 = arith.constant 0 : index
      %34 = vector.load %arg3[%c0_22, %c0_23] : memref<1x32xf32, #tpu.memory_space<vmem>>, vector<1x32xf32>
      %35 = vector.broadcast %34 : vector<1x32xf32> to vector<16x32xf32>
      %36 = arith.mulf %33, %35 : vector<16x32xf32>
      %c0_24 = arith.constant 0 : index
      %c0_25 = arith.constant 0 : index
      %37 = vector.load %arg8[%c0_24, %c0_25] : memref<16x32xf32, #tpu.memory_space<vmem>>, vector<16x32xf32>
      tpu.vector_store %arg8[%c0_24, %c0_25], %36 {strides = array<i32>} : memref<16x32xf32, #tpu.memory_space<vmem>>, vector<16x32xf32>,
      %cst_26 = arith.constant 0.000000e+00 : f32
      %38 = vector.broadcast %cst_26 : f32 to vector<16x32xf32>
      %c0_27 = arith.constant 0 : index
      %c0_28 = arith.constant 0 : index
      %39 = vector.load %arg9[%c0_27, %c0_28] : memref<16x32xf32, #tpu.memory_space<vmem>>, vector<16x32xf32>
      tpu.vector_store %arg9[%c0_27, %c0_28], %38 {strides = array<i32>} : memref<16x32xf32, #tpu.memory_space<vmem>>, vector<16x32xf32>,
    } else {
    }
    %c0 = arith.constant 0 : index
    %c0_1 = arith.constant 0 : index
    %3 = vector.load %arg8[%c0, %c0_1] : memref<16x32xf32, #tpu.memory_space<vmem>>, vector<16x32xf32>
    %c0_2 = arith.constant 0 : index
    %c0_3 = arith.constant 0 : index
    %4 = vector.load %arg4[%c0_2, %c0_3] : memref<32x128xf32, #tpu.memory_space<vmem>>, vector<32x128xf32>
    %cst = arith.constant dense<0.000000e+00> : vector<16x128xf32>
    %5 = tpu.matmul %3, %4, %cst {dimension_numbers = #tpu.dot_dimension_numbers<[1], [0], [0], [1], [0, 0, 1, 1], [], []>} : vector<16x32xf32>, vector<32x128xf32>, vector<16x128xf32> -> vector<16x128xf32>
    %c0_4 = arith.constant 0 : index
    %c0_5 = arith.constant 0 : index
    %6 = vector.load %arg5[%c0_4, %c0_5] : memref<32x128xf32, #tpu.memory_space<vmem>>, vector<32x128xf32>
    %cst_6 = arith.constant dense<0.000000e+00> : vector<16x128xf32>
    %7 = tpu.matmul %3, %6, %cst_6 {dimension_numbers = #tpu.dot_dimension_numbers<[1], [0], [0], [1], [0, 0, 1, 1], [], []>} : vector<16x32xf32>, vector<32x128xf32>, vector<16x128xf32> -> vector<16x128xf32>
    %8 = arith.negf %5 : vector<16x128xf32>
    %9 = math.exp %8 : vector<16x128xf32>
    %cst_7 = arith.constant 1.000000e+00 : f32
    %10 = vector.broadcast %cst_7 : f32 to vector<16x128xf32>
    %11 = arith.addf %10, %9 : vector<16x128xf32>
    %12 = arith.divf %10, %11 : vector<16x128xf32>
    %13 = arith.mulf %5, %12 : vector<16x128xf32>
    %14 = arith.mulf %13, %7 : vector<16x128xf32>
    %c0_8 = arith.constant 0 : index
    %c0_9 = arith.constant 0 : index
    %15 = vector.load %arg9[%c0_8, %c0_9] : memref<16x32xf32, #tpu.memory_space<vmem>>, vector<16x32xf32>
    %c0_10 = arith.constant 0 : index
    %c0_11 = arith.constant 0 : index
    %16 = vector.load %arg6[%c0_10, %c0_11] : memref<128x32xf32, #tpu.memory_space<vmem>>, vector<128x32xf32>
    %cst_12 = arith.constant dense<0.000000e+00> : vector<16x32xf32>
    %17 = tpu.matmul %14, %16, %cst_12 {dimension_numbers = #tpu.dot_dimension_numbers<[1], [0], [0], [1], [0, 0, 1, 1], [], []>} : vector<16x128xf32>, vector<128x32xf32>, vector<16x32xf32> -> vector<16x32xf32>
    %18 = arith.addf %15, %17 : vector<16x32xf32>
    %c0_13 = arith.constant 0 : index
    %c0_14 = arith.constant 0 : index
    %19 = vector.load %arg9[%c0_13, %c0_14] : memref<16x32xf32, #tpu.memory_space<vmem>>, vector<16x32xf32>
    tpu.vector_store %arg9[%c0_13, %c0_14], %18 {strides = array<i32>} : memref<16x32xf32, #tpu.memory_space<vmem>>, vector<16x32xf32>,
    %c0_i32_15 = arith.constant 0 : i32
    %20 = arith.cmpi eq, %arg1, %c0_i32_15 : i32
    %21 = arith.extui %20 : i1 to i32
    %c0_i32_16 = arith.constant 0 : i32
    %22 = arith.cmpi ne, %21, %c0_i32_16 : i32
    scf.if %22 {
      %c0_17 = arith.constant 0 : index
      %c0_18 = arith.constant 0 : index
      %23 = vector.load %arg2[%c0_17, %c0_18] : memref<16x32xf32, #tpu.memory_space<vmem>>, vector<16x32xf32>
      %c0_19 = arith.constant 0 : index
      %c0_20 = arith.constant 0 : index
      %24 = vector.load %arg9[%c0_19, %c0_20] : memref<16x32xf32, #tpu.memory_space<vmem>>, vector<16x32xf32>
      %25 = arith.addf %23, %24 : vector<16x32xf32>
      %c0_21 = arith.constant 0 : index
      %c0_22 = arith.constant 0 : index
      %26 = vector.load %arg7[%c0_21, %c0_22] : memref<16x32xf32, #tpu.memory_space<vmem>>, vector<16x32xf32>
      tpu.vector_store %arg7[%c0_21, %c0_22], %25 {strides = array<i32>} : memref<16x32xf32, #tpu.memory_space<vmem>>, vector<16x32xf32>,
    } else {
    }
    return
  }
  func.func @transform_0(%arg0: i32, %arg1: i32) -> (i32, i32) {
    %c0_i32 = arith.constant 0 : i32
    %c0_i32_0 = arith.constant 0 : i32
    return %arg0, %c0_i32 : i32, i32
  }
  func.func @transform_1(%arg0: i32, %arg1: i32) -> (i32, i32) {
    %c0_i32 = arith.constant 0 : i32
    %c0_i32_0 = arith.constant 0 : i32
    %c0_i32_1 = arith.constant 0 : i32
    return %c0_i32, %c0_i32_0 : i32, i32
  }
  func.func @transform_2(%arg0: i32, %arg1: i32) -> (i32, i32) {
    %c0_i32 = arith.constant 0 : i32
    %c0_i32_0 = arith.constant 0 : i32
    return %c0_i32, %arg1 : i32, i32
  }
  func.func @transform_3(%arg0: i32, %arg1: i32) -> (i32, i32) {
    %c0_i32 = arith.constant 0 : i32
    %c0_i32_0 = arith.constant 0 : i32
    return %c0_i32, %arg1 : i32, i32
  }
  func.func @transform_4(%arg0: i32, %arg1: i32) -> (i32, i32) {
    %c0_i32 = arith.constant 0 : i32
    %c0_i32_0 = arith.constant 0 : i32
    return %arg1, %c0_i32 : i32, i32
  }
  func.func @transform_5(%arg0: i32, %arg1: i32) -> (i32, i32) {
    %c0_i32 = arith.constant 0 : i32
    %c0_i32_0 = arith.constant 0 : i32
    return %arg0, %c0_i32 : i32, i32
  }
}

</mosaic_0001>

<bundles_post_ra>
// kernel: decoder_layer.6
= control target key start
LH: loop header
LB: loop body
LE: loop exit
PB: predicated region body
PF: predicated region fallthrough
CT: control target
= control target key end

     0   :  { %vm20_vm0 = vcmask 261120   ;;  %s185_s1 = inlined_call_operand.vmem [shape: f32[32,32], index: 1, kind: input, shape index: {}]   ;;  %s186_s0 = inlined_call_operand.vmem [shape: f32[16,32], index: 0, kind: input, shape index: {}]   ;;  %s187_s2 = inlined_call_operand.vmem [shape: f32[16,32], index: 2, kind: input, shape index: {}]   ;;  %s188_s3 = inlined_call_operand.vmem [shape: f32[16,32], index: 3, kind: output, shape index: {}]  }
   0x1   :  { %v19_v0 = vld [vmem:[%s185_s1 + $0x18] sm:$0xff]  ;;  %v18_v1 = vld [vmem:[%s185_s1 + $0x10] sm:$0xff]  ;;  %v14_v2 = vld [vmem:[%s186_s0] sm:$0xff] }
   0x2   :  { %120 = vmatprep.subr.mxu0 %v19_v0  ;;  %v17_v3 = vld [vmem:[%s185_s1 + $0x8] sm:$0xff]  ;;  %128 = vmatprep.mubr.msk.f32.mxu0 %vm20_vm0, %v14_v2  ;;  %v16_v4 = vld [vmem:[%s185_s1] sm:$0xff] }
   0x3   :  { %121 = vmatpush3.msra.mxu0 %v19_v0  ;;  %v15_v5 = vld [vmem:[%s186_s0 + $0x8] sm:$0xff]  ;;  %v102_v8 = vld [vmem:[%s187_s2] sm:$0xff] }
   0x4   :  { %122 = vmatprep.subr.mxu0 %v18_v1  ;;  %v103_v6 = vld [vmem:[%s187_s2 + $0x8] sm:$0xff] }
   0x5   :  { %123 = vmatpush3.msra.mxu0 %v18_v1 }
   0x6   :  { %124 = vmatprep.subr.mxu0 %v17_v3 }
   0x7   :  { %125 = vmatpush3.msra.mxu0 %v17_v3 }
   0x8   :  { %126 = vmatprep.subr.mxu0 %v16_v4 }
   0x9   :  { %127 = vmatpush3.msra.mxu0 %v16_v4 }
   0xa   :  { %129 = vmatmul.mubr.msk.f32.vlgmr.msra.gmra.mxu0 %vm20_vm0, %v15_v5 }
  0xca   :  { %v130_v7 = vpop.f32.mrf.mxu0 }
  0xcb   :  { %v105_v9 = vadd.f32 %v130_v7, %v103_v6 }
  0xcc   :  { %v93_v10 = vpop.f32.mrf.mxu0 }
  0xcd   :  { %107 = vst.msk [vmem:[%s188_s3 + $0x8] sm:$0xff] %vm20_vm0, %v105_v9  ;;  %v104_v11 = vadd.f32 %v102_v8, %v93_v10 }
  0xcf   :  { %106 = vst.msk [vmem:[%s188_s3] sm:$0xff] %vm20_vm0, %v104_v11 }

// kernel: decoder_layer.4
= control target key start
LH: loop header
LB: loop body
LE: loop exit
PB: predicated region body
PF: predicated region fallthrough
CT: control target
= control target key end

     0   :  { %8 = vsyncpa [#allocation3], 0  ;;  %s279_s0 = inlined_call_operand.hbm [shape: f32[16,32], index: 0, kind: input, shape index: {}]   ;;  %s280_s1 = inlined_call_operand.vmem [shape: f32[1,32], index: 1, kind: input, shape index: {}]   ;;  %s281_s2 = inlined_call_operand.hbm [shape: f32[32,96], index: 2, kind: input, shape index: {}]   ;;  %s282_s3 = inlined_call_operand.vmem [shape: f32[16,96], index: 3, kind: output, shape index: {}]  }
   0x1   :  { %9 = vsyncpa [#allocation5], 0  ;;  %s236_s12 = smov [#allocation2]  }
   0x2   :  { %s15_s13 = sshll.u32 %s236_s12, 4  ;;  %s16_s13 = int_to_ptr.vmem [resolvable:$true] %s15_s13 }
   0x3   :  { %s200_s14 = scalar_lea.vmem %s16_s13, 256  ;;  %p205_p1 = scmp.lt.s32.totalorder %s16_s13, %s16_s13 }
   0x4   :  { %p201_p0 = scmp.ne.s32.totalorder %s16_s13, %s200_s14  ;;  %p206_p2 = scmp.lt.s32.totalorder %s200_s14, %s200_s14 }
   0x6   :  { %p207_p3 = por %p206_p2, %p205_p1 }
   0x8   :  { %p208_p4 = pnand %p207_p3, %p201_p0 }
   0xa   :  { %211 = shalt.err (!%p208_p4)
}
   0xb   :  { %s237_s15 = smov 128   ;;  %s238_s16 = smov 8  }
   0xc   :  { %21 = dma.hbm_to_vmem [thread:$0]  %s279_s0, 256, %s16_s13, [#allocation3], %s237_s15, %s237_s15, %s238_s16  }
   0xd   :  { %s239_s19 = smov [#allocation4]  }
   0xe   :  { %s29_s20 = sshll.u32 %s239_s19, 4  ;;  %s30_s20 = int_to_ptr.vmem [resolvable:$true] %s29_s20 }
   0xf   :  { %s220_s21 = scalar_lea.vmem %s30_s20, 512  ;;  %p225_p6 = scmp.lt.s32.totalorder %s30_s20, %s30_s20 }
  0x10   :  { %p221_p5 = scmp.ne.s32.totalorder %s30_s20, %s220_s21  ;;  %p226_p7 = scmp.lt.s32.totalorder %s220_s21, %s220_s21 }
  0x12   :  { %p227_p8 = por %p226_p7, %p225_p6 }
  0x14   :  { %p228_p9 = pnand %p227_p8, %p221_p5 }
  0x16   :  { %231 = shalt.err (!%p228_p9)
}
  0x17   :  { %35 = dma.hbm_to_vmem [thread:$0]  %s281_s2, 512, %s30_s20, [#allocation5], %s237_s15, %s237_s15, %s238_s16  }
  0x18   :  { %232 = dma.done.wait [#allocation3], 256  }
  0x19   :  { %233 = vsyncadd [#allocation3], 4294967040 }
  0x1a   :  { %234 = dma.done.wait [#allocation5], 512  }
  0x1b   :  { %235 = vsyncadd [#allocation5], 4294966784  ;;  %v42_v0 = vld [vmem:[#allocation2] sm:$0xff]  ;;  %vm46_vm0 = vcmask 261120   ;;  %v43_v1 = vld [vmem:[#allocation2 + $0x8] sm:$0xff]  ;;  %vm155_vm1 = vcmask 785408  }
  0x1c   :  { %v44_v2 = vmul.f32 %v42_v0, %v42_v0  ;;  %v45_v3 = vmul.f32 %v43_v1, %v43_v1  ;;  %v73_v6 = vld [vmem:[#allocation4 + $0x18] sm:$0xff]  ;;  %v72_v7 = vld [vmem:[#allocation4 + $0x10] sm:$0xff]  ;;  %v71_v8 = vld [vmem:[#allocation4 + $0x8] sm:$0xff] }
  0x1d   :  { %173 = vmatprep.subr.mxu0 %v73_v6  ;;  %v70_v9 = vld [vmem:[#allocation4] sm:$0xff]  ;;  %v164_v17 = vld [vmem:[%s280_s1] ss:$0 sm:$0xff] }
  0x1e   :  { %v47_v4 = vsel %vm46_vm0, %v44_v2, 0.0  ;;  %v50_v5 = vsel %vm46_vm0, %v45_v3, 0.0  ;;  %174 = vmatpush3.msra.mxu0 %v73_v6 }
  0x1f   :  { %48 = vadd.xlane.f32.xlu0 %v47_v4  ;;  %175 = vmatprep.subr.mxu0 %v72_v7 }
  0x20   :  { %176 = vmatpush3.msra.mxu0 %v72_v7 }
  0x21   :  { %177 = vmatprep.subr.mxu0 %v71_v8 }
  0x22   :  { %178 = vmatpush3.msra.mxu0 %v71_v8 }
  0x23   :  { %51 = vadd.xlane.f32.xlu0 %v50_v5  ;;  %179 = vmatprep.subr.mxu0 %v70_v9 }
  0x24   :  { %180 = vmatpush3.msra.mxu0 %v70_v9 }
  0xa8   :  { %v49_v10 = vpop.xlane.xlu0 %48 }
  0xa9   :  { %v53_v11 = vmul.f32 0.03125, %v49_v10 }
  0xab   :  { %v55_v12 = vadd.f32 1e-05, %v53_v11 }
  0xac   :  { %v52_v13 = vpop.xlane.xlu0 %51 }
  0xad   :  { %188 = vrsqrt.f32 %v55_v12  ;;  %v54_v14 = vmul.f32 0.03125, %v52_v13 }
  0xaf   :  { %v56_v15 = vadd.f32 1e-05, %v54_v14 }
  0xb1   :  { %190 = vrsqrt.f32 %v56_v15 }
  0xba   :  { %v189_v16 = vpop.eup %188 }
  0xbb   :  { %v59_v18 = vmul.f32 %v189_v16, %v42_v0 }
  0xbd   :  { %v68_v19 = vmul.f32 %v164_v17, %v59_v18 }
  0xbe   :  { %v191_v20 = vpop.eup %190 }
  0xbf   :  { %v60_v21 = vmul.f32 %v191_v20, %v43_v1  ;;  %181 = vmatprep.mubr.msk.f32.mxu0 %vm46_vm0, %v68_v19 }
  0xc1   :  { %v69_v22 = vmul.f32 %v164_v17, %v60_v21 }
  0xc3   :  { %182 = vmatmul.mubr.msk.f32.vlgmr.msra.gmra.mxu0 %vm46_vm0, %v69_v22 }
 0x183   :  { %v183_v23 = vpop.f32.mrf.mxu0 }
 0x184   :  { %157 = vst.msk [vmem:[%s282_s3 + $0x8] sm:$0xff] %vm155_vm1, %v183_v23 }
 0x185   :  { %v146_v24 = vpop.f32.mrf.mxu0 }
 0x186   :  { %156 = vst.msk [vmem:[%s282_s3] sm:$0xff] %vm155_vm1, %v146_v24 }
 0x187   :  { %162 = vsyncpa [#allocation3], 1 }
 0x188   :  { %163 = vsyncpa [#allocation5], 1 }

// kernel: decoder_layer.5
= control target key start
LH: loop header
LB: loop body
LE: loop exit
PB: predicated region body
PF: predicated region fallthrough
CT: control target
= control target key end

     0   :  { %s1413_s12 = smov 0   ;;  %s1415_s13 = smov 0   ;;  %s1581_s0 = inlined_call_operand.vmem [shape: f32[16,32], index: 0, kind: input, shape index: {}]   ;;  %s1582_s1 = inlined_call_operand.vmem [shape: f32[16,32], index: 1, kind: input, shape index: {}]   ;;  %s1583_s2 = inlined_call_operand.vmem [shape: f32[16,32], index: 2, kind: input, shape index: {}]   ;;  %s1584_s3 = inlined_call_operand.vmem [shape: f32[16,32], index: 3, kind: output, shape index: {}]  }
   0x1   :  { %s1417_s14 = smov 0  }
   0x2 LB: > { %s32_s15 = sadd.s32 1, %s1377_s13  ;;  %p1224_p0 = scmp.ge.s32.totalorder %s1381_s14, 1  ;;  %s1381_s14 = sphi %s1417_s14, %s13_s14   ;;  %s1377_s13 = sphi %s1415_s13, %s1586_s13   ;;  %s1373_s12 = sphi %s1413_s12, %s1585_s12  }
   0x3   : > { %p34_p1 = scmp.ge.s32.totalorder %s32_s15, 2  ;;  %p187_p2 = scmp.lt.s32.totalorder %s1381_s14, 3 }
   0x5   : > { %s1588_s15 = smov (%p34_p1, %s32_s15), 0  ;;  %p188_p3 = pnand %p1224_p0, %p187_p2 }
   0x6   : > { %p222_p4 = scmp.lt.s32.totalorder (!%p188_p3), %s1373_s12, 1  ;;  %s1387_s23 = smov (!%p188_p3), 120  }
   0x7   : > { %191 = sbr.rel (%p188_p3) target bundleno = 1390 (0x56e), region = 32  ;;  %s1388_s24 = smov (!%p188_p3), 112  }
   0x8   : > { %s1389_s25 = smov (!%p188_p3), 104   ;;  %s1390_s29 = smov (!%p188_p3), 8  }
   0x9   : > { %s1391_s6 = smov (!%p188_p3), 16   ;;  %s1392_s7 = smov (!%p188_p3), 24  }
   0xc   : > { %vm258_vm0 = vcmask 64512   ;;  %v1383_v0 = vmov 0.0   ;;  %vm1384_vm1 = vmmov 0   ;;  %s1590_s12 = smov (!%p222_p4, %s1373_s12), 1  ;;  %vm249_vm2 = vcmask 7168  }
   0xd   : > { %1259 = vmatprep.subr.mxu0 %v1383_v0  ;;  %259 = vst.msk [vmem:[#allocation4] sm:$0xff] %vm258_vm0, %v1383_v0  ;;  %260 = vst.msk [vmem:[#allocation4 + $0x8] sm:$0xff] %vm258_vm0, %v1383_v0  ;;  %1261 = vmatprep.mubr.msk.f32.mxu0 %vm1384_vm1, %v1383_v0  ;;  %s1445_s16 = sshll.u32 %s1590_s12, 3  ;;  %v1385_v4 = vmov -inf   ;;  %v271_v5 = vlaneseq  ;;  %v1386_v12 = vmov 0   ;;  %vm1092_vm4 = vcmask 130112  }
   0xe   : > { %261 = vst.msk [vmem:[#allocation4 + $0x10] sm:$0xff] %vm258_vm0, %v1383_v0  ;;  %262 = vst.msk [vmem:[#allocation4 + $0x18] sm:$0xff] %vm258_vm0, %v1383_v0  ;;  %1264 = vmatprep.subr.mxu1 %v1383_v0  ;;  %1266 = vmatprep.mubr.msk.f32.mxu1 %vm1384_vm1, %v1383_v0  ;;  %s231_s19 = scalar_lea.vmem %s1582_s1, %s1445_s16  ;;  %s225_s22 = scalar_lea.vmem %s1581_s0, %s1445_s16  ;;  %vm1109_vm5 = vcmask 195712   ;;  %vm1126_vm6 = vcmask 261312  }
   0xf   : > { %v282_v1 = vld [vmem:[%s231_s19] sm:$0xff]  ;;  %250 = vst.msk [vmem:[#allocation2] sm:$0xff] %vm249_vm2, %v1385_v4  ;;  %251 = vst.msk [vmem:[#allocation2 + $0x8] sm:$0xff] %vm249_vm2, %v1385_v4  ;;  %v1472_v6 = vshrl.u32 %v271_v5, 7  ;;  %v1474_v7 = vand.u32 127, %v271_v5  ;;  %1333 = vset.pattern.permute.xlu0 %v1386_v12  ;;  %1334 = vset.pattern.permute.xlu1 %v1386_v12  ;;  %s237_s28 = scalar_lea.vmem %s1583_s2, %s1445_s16  ;;  %s243_s5 = scalar_lea.vmem %s1584_s3, %s1445_s16 }
  0x10   : > { %v280_v2 = vld [vmem:[%s225_s22] sm:$0xff]  ;;  %1260 = vmatpush3.xpose.msk.msra.mxu0 %vm258_vm0, %v282_v1  ;;  %252 = vst.msk [vmem:[#allocation2 + $0x10] sm:$0xff] %vm249_vm2, %v1385_v4  ;;  %253 = vst.msk [vmem:[#allocation2 + $0x18] sm:$0xff] %vm249_vm2, %v1385_v4  ;;  %477 = vrot.lane.b32.xlu1 %v282_v1, %s1387_s23 }
  0x11   : > { %v281_v3 = vmul.f32 0.35355338, %v280_v2  ;;  %1274 = vmatprep.subr.mxu0 %v1383_v0  ;;  %254 = vst.msk [vmem:[#allocation3] sm:$0xff] %vm249_vm2, %v1383_v0  ;;  %255 = vst.msk [vmem:[#allocation3 + $0x8] sm:$0xff] %vm249_vm2, %v1383_v0  ;;  %vm279_vm3 = vcmp.le.s32.totalorder %v1474_v7, %v1472_v6  ;;  %v283_v17 = vld [vmem:[%s237_s28] sm:$0xff] }
  0x12   : > { %256 = vst.msk [vmem:[#allocation3 + $0x10] sm:$0xff] %vm249_vm2, %v1383_v0  ;;  %257 = vst.msk [vmem:[#allocation3 + $0x18] sm:$0xff] %vm249_vm2, %v1383_v0  ;;  %1265 = vmatpush3.msra.mxu1 %v283_v17 }
  0x13   : > { %1262 = vmatmul.mubr.msk.f32.vlgmr.msra.gmra.mxu0 %vm258_vm0, %v281_v3  ;;  %1269 = vmatprep.subr.mxu1 %v1383_v0 }
  0x14   : > { %1276 = vmatprep.mubr.msk.f32.mxu0 %vm1384_vm1, %v1383_v0  ;;  %474 = vrot.lane.b32.xlu1 %v281_v3, %s1387_s23 }
  0x16   : > { %v1488_v13 = vld [vmem:[#allocation2] sm:$0xff]  ;;  %v555_v42 = vld [vmem:[#allocation2 + $0x8] sm:$0xff] }
  0x17   : > { %v753_v45 = vld [vmem:[#allocation2 + $0x10] sm:$0xff]  ;;  %v951_v49 = vld [vmem:[#allocation2 + $0x18] sm:$0xff] }
  0x18   : > { %675 = vrot.lane.b32.xlu1 %v282_v1, %s1388_s24 }
  0x1c   : > { %672 = vrot.lane.b32.xlu1 %v281_v3, %s1388_s24 }
  0x20   : > { %873 = vrot.lane.b32.xlu1 %v282_v1, %s1389_s25 }
  0x24   : > { %870 = vrot.lane.b32.xlu1 %v281_v3, %s1389_s25 }
  0x82   : > { %v478_v18 = vpop.permute.xlu1 %477 }
  0x86   : > { %v475_v22 = vpop.permute.xlu1 %474 }
  0x8a   : > { %v676_v23 = vpop.permute.xlu1 %675 }
  0x8e   : > { %v673_v24 = vpop.permute.xlu1 %672 }
  0x92   : > { %v874_v26 = vpop.permute.xlu1 %873 }
  0x96   : > { %v871_v27 = vpop.permute.xlu1 %870 }
  0xd3   : > { %v357_v8 = vpop.f32.mrf.mxu0 }
  0xd4   : > { %v361_v9 = vsel %vm279_vm3, %v357_v8, -1e+30 }
  0xd5   : > { %v1263_v10 = vpop.f32.mrf.mxu0  ;;  %v363_v11 = vsel %vm258_vm0, %v361_v9, -inf }
  0xd6   : > { %364 = vmax.xlane.f32.xlu0 %v363_v11 }
 0x15f   : > { %v365_v14 = vpop.xlane.xlu0 %364 }
 0x160   : > { %v1491_v15 = vmax.f32 %v1488_v13, %v365_v14 }
 0x162   : > { %v367_v16 = vsub.f32 %v1488_v13, %v1491_v15  ;;  %468 = vst.msk [vmem:[#allocation2] sm:$0xff] %vm249_vm2, %v1491_v15  ;;  %372 = vperm.xlu0 %1333, %v1491_v15  }
 0x164   : > { %v368_v12 = vmul.f32 1.442695, %v367_v16 }
 0x1dd   : > { %v373_v19 = vpop.permute.xlu0 %372 }
 0x1de   : > { %v375_v20 = vsub.f32 %v361_v9, %v373_v19 }
 0x1e0   : > { %v376_v21 = vmul.f32 1.442695, %v375_v20  ;;  %v572_v20 = vld [vmem:[#allocation3 + $0x8] sm:$0xff] }
 0x1e2   : > { %1335 = vpow2.f32 %v376_v21 }
 0x1ef   : > { %v1503_v25 = vpop.eup %1335 }
 0x1f0   : > { %1267 = vmatmul.mubr.msk.f32.vlgmr.msra.gmra.mxu1 %vm258_vm0, %v1503_v25  ;;  %v380_v8 = vsel %vm258_vm0, %v1503_v25, 0.0 }
 0x1f1   : > { %1270 = vmatpush3.xpose.msk.msra.mxu1 %vm258_vm0, %v478_v18  ;;  %1271 = vmatprep.mubr.msk.f32.mxu1 %vm1384_vm1, %v1383_v0 }
 0x1f2   : > { %1279 = vmatprep.subr.mxu1 %v1383_v0 }
 0x1f4   : > { %1272 = vmatmul.mubr.msk.f32.vlgmr.msra.gmra.mxu1 %vm258_vm0, %v475_v22 }
 0x1f5   : > { %1280 = vmatpush3.xpose.msk.msra.mxu1 %vm258_vm0, %v676_v23  ;;  %1281 = vmatprep.mubr.msk.f32.mxu1 %vm1384_vm1, %v1383_v0  ;;  %v770_v23 = vld [vmem:[#allocation3 + $0x10] sm:$0xff] }
 0x1f6   : > { %1289 = vmatprep.subr.mxu1 %v1383_v0 }
 0x1f8   : > { %1282 = vmatmul.mubr.msk.f32.vlgmr.msra.gmra.mxu1 %vm258_vm0, %v673_v24  ;;  %v378_v24 = vld [vmem:[#allocation3] sm:$0xff] }
 0x1f9   : > { %1290 = vmatpush3.xpose.msk.msra.mxu1 %vm258_vm0, %v874_v26  ;;  %1291 = vmatprep.mubr.msk.f32.mxu1 %vm1384_vm1, %v1383_v0 }
 0x1fc   : > { %1292 = vmatmul.mubr.msk.f32.vlgmr.msra.gmra.mxu1 %vm258_vm0, %v871_v27  ;;  %v968_v27 = vld [vmem:[#allocation3 + $0x18] sm:$0xff] }
 0x2b0   : > { %v1521_v28 = vpop.f32.mrf.mxu1 }
 0x2b2   : > { %v1268_v29 = vpop.f32.mrf.mxu1 }
 0x2b4   : > { %v549_v30 = vpop.f32.mrf.mxu1 }
 0x2b5   : > { %v553_v31 = vsel %vm279_vm3, %v549_v30, -1e+30 }
 0x2b6   : > { %v1273_v32 = vpop.f32.mrf.mxu1  ;;  %v556_v33 = vsel %vm258_vm0, %v553_v31, -inf }
 0x2b7   : > { %557 = vmax.xlane.f32.xlu1 %v556_v33 }
 0x2b8   : > { %v747_v34 = vpop.f32.mrf.mxu1 }
 0x2b9   : > { %v751_v35 = vsel %vm279_vm3, %v747_v34, -1e+30 }
 0x2ba   : > { %v1283_v36 = vpop.f32.mrf.mxu1  ;;  %v754_v37 = vsel %vm258_vm0, %v751_v35, -inf }
 0x2bb   : > { %755 = vmax.xlane.f32.xlu0 %v754_v37 }
 0x2bc   : > { %v945_v38 = vpop.f32.mrf.mxu1 }
 0x2bd   : > { %v949_v39 = vsel %vm279_vm3, %v945_v38, -1e+30 }
 0x2be   : > { %v1293_v40 = vpop.f32.mrf.mxu1  ;;  %v952_v41 = vsel %vm258_vm0, %v949_v39, -inf }
 0x2bf   : > { %953 = vmax.xlane.f32.xlu1 %v952_v41 }
 0x340   : > { %v558_v43 = vpop.xlane.xlu1 %557 }
 0x341   : > { %v559_v44 = vmax.f32 %v555_v42, %v558_v43 }
 0x343   : > { %v560_v46 = vsub.f32 %v555_v42, %v559_v44  ;;  %666 = vst.msk [vmem:[#allocation2 + $0x8] sm:$0xff] %vm249_vm2, %v559_v44  ;;  %565 = vperm.xlu1 %1334, %v559_v44  }
 0x344   : > { %v756_v47 = vpop.xlane.xlu0 %755 }
 0x345   : > { %v757_v48 = vmax.f32 %v753_v45, %v756_v47  ;;  %v561_v6 = vmul.f32 1.442695, %v560_v46  ;;  %v657_v47 = vld [vmem:[#allocation4 + $0x8] sm:$0xff] }
 0x347   : > { %v758_v50 = vsub.f32 %v753_v45, %v757_v48  ;;  %864 = vst.msk [vmem:[#allocation2 + $0x10] sm:$0xff] %vm249_vm2, %v757_v48  ;;  %763 = vperm.xlu0 %1333, %v757_v48  }
 0x348   : > { %v954_v51 = vpop.xlane.xlu1 %953 }
 0x349   : > { %v955_v52 = vmax.f32 %v951_v49, %v954_v51  ;;  %v759_v10 = vmul.f32 1.442695, %v758_v50 }
 0x34b   : > { %v956_v53 = vsub.f32 %v951_v49, %v955_v52  ;;  %1062 = vst.msk [vmem:[#allocation2 + $0x18] sm:$0xff] %vm249_vm2, %v955_v52  ;;  %961 = vperm.xlu1 %1334, %v955_v52   ;;  %v855_v49 = vld [vmem:[#allocation4 + $0x10] sm:$0xff] }
 0x34d   : > { %v957_v14 = vmul.f32 1.442695, %v956_v53 }
 0x34f   : > { %580 = vrot.lane.b32.xlu1 %v283_v17, %s1387_s23 }
 0x353   : > { %778 = vrot.lane.b32.xlu1 %v283_v17, %s1388_s24 }
 0x357   : > { %976 = vrot.lane.b32.xlu1 %v283_v17, %s1389_s25 }
 0x3be   : > { %v566_v54 = vpop.permute.xlu1 %565 }
 0x3bf   : > { %v568_v55 = vsub.f32 %v553_v31, %v566_v54  ;;  %v1053_v54 = vld [vmem:[#allocation4 + $0x18] sm:$0xff] }
 0x3c1   : > { %v569_v56 = vmul.f32 1.442695, %v568_v55 }
 0x3c2   : > { %v764_v57 = vpop.permute.xlu0 %763 }
 0x3c3   : > { %1337 = vpow2.f32 %v569_v56  ;;  %v766_v58 = vsub.f32 %v751_v35, %v764_v57  ;;  %v459_v35 = vld [vmem:[#allocation4] sm:$0xff] }
 0x3c5   : > { %v767_v59 = vmul.f32 1.442695, %v766_v58 }
 0x3c6   : > { %v962_v60 = vpop.permute.xlu1 %961 }
 0x3c7   : > { %1339 = vpow2.f32 %v767_v59  ;;  %v964_v61 = vsub.f32 %v949_v39, %v962_v60 }
 0x3c9   : > { %v965_v62 = vmul.f32 1.442695, %v964_v61 }
 0x3ca   : > { %v581_v63 = vpop.permute.xlu1 %580 }
 0x3cb   : > { %1341 = vpow2.f32 %v965_v62  ;;  %1275 = vmatpush3.msra.mxu0 %v581_v63 }
 0x3cc   : > { %1284 = vmatprep.subr.mxu0 %v1383_v0  ;;  %1343 = vpow2.f32 %v561_v6 }
 0x3cd   : > { %1345 = vpow2.f32 %v759_v10 }
 0x3ce   : > { %v779_v1 = vpop.permute.xlu1 %778  ;;  %1347 = vpow2.f32 %v368_v12 }
 0x3cf   : > { %1349 = vpow2.f32 %v957_v14 }
 0x3d0   : > { %v1338_v2 = vpop.eup %1337 }
 0x3d1   : > { %1277 = vmatmul.mubr.msk.f32.vlgmr.msra.gmra.mxu0 %vm258_vm0, %v1338_v2  ;;  %v574_v3 = vsel %vm258_vm0, %v1338_v2, 0.0 }
 0x3d2   : > { %575 = vadd.xlane.f32.xlu1 %v574_v3  ;;  %1285 = vmatpush3.msra.mxu0 %v779_v1  ;;  %v977_v5 = vpop.permute.xlu1 %976 }
 0x3d3   : > { %1286 = vmatprep.mubr.msk.f32.mxu0 %vm1384_vm1, %v1383_v0  ;;  %1294 = vmatprep.subr.mxu0 %v1383_v0 }
 0x3d4   : > { %v1340_v4 = vpop.eup %1339 }
 0x3d5   : > { %1287 = vmatmul.mubr.msk.f32.vlgmr.msra.gmra.mxu0 %vm258_vm0, %v1340_v4  ;;  %v772_v7 = vsel %vm258_vm0, %v1340_v4, 0.0 }
 0x3d6   : > { %773 = vadd.xlane.f32.xlu0 %v772_v7  ;;  %381 = vadd.xlane.f32.xlu1 %v380_v8 }
 0x3d7   : > { %1295 = vmatpush3.msra.mxu0 %v977_v5  ;;  %1296 = vmatprep.mubr.msk.f32.mxu0 %vm1384_vm1, %v1383_v0 }
 0x3d8   : > { %v1342_v9 = vpop.eup %1341 }
 0x3d9   : > { %1297 = vmatmul.mubr.msk.f32.vlgmr.msra.gmra.mxu0 %vm258_vm0, %v1342_v9  ;;  %v970_v11 = vsel %vm258_vm0, %v1342_v9, 0.0  ;;  %v1344_v17 = vpop.eup %1343 }
 0x3da   : > { %971 = vadd.xlane.f32.xlu0 %v970_v11  ;;  %v1346_v18 = vpop.eup %1345  ;;  %v573_v21 = vmul.f32 %v1344_v17, %v572_v20 }
 0x3db   : > { %v1348_v0 = vpop.eup %1347  ;;  %v771_v13 = vmul.f32 %v1346_v18, %v770_v23 }
 0x3dc   : > { %v1350_v19 = vpop.eup %1349  ;;  %v379_v15 = vmul.f32 %v1348_v0, %v378_v24 }
 0x3dd   : > { %v969_v31 = vmul.f32 %v1350_v19, %v968_v27 }
 0x3e7   : > { %660 = vperm.xlu1 %1334, %v1344_v17  }
 0x3eb   : > { %858 = vperm.xlu1 %1334, %v1346_v18  }
 0x3f0   : > { %462 = vperm.xlu0 %1333, %v1348_v0  }
 0x3f4   : > { %1056 = vperm.xlu0 %1333, %v1350_v19  }
 0x45b   : > { %v576_v22 = vpop.xlane.xlu1 %575 }
 0x45c   : > { %v577_v25 = vadd.f32 %v576_v22, %v573_v21 }
 0x45e   : > { %578 = vst.msk [vmem:[#allocation3 + $0x8] sm:$0xff] %vm249_vm2, %v577_v25 }
 0x45f   : > { %v774_v16 = vpop.xlane.xlu0 %773  ;;  %v382_v26 = vpop.xlane.xlu1 %381 }
 0x460   : > { %v775_v29 = vadd.f32 %v774_v16, %v771_v13  ;;  %v383_v30 = vadd.f32 %v382_v26, %v379_v15 }
 0x462   : > { %776 = vst.msk [vmem:[#allocation3 + $0x10] sm:$0xff] %vm249_vm2, %v775_v29  ;;  %385 = vst.msk [vmem:[#allocation3] sm:$0xff] %vm249_vm2, %v383_v30 }
 0x463   : > { %v972_v32 = vpop.xlane.xlu0 %971  ;;  %v661_v46 = vpop.permute.xlu1 %660 }
 0x464   : > { %v973_v33 = vadd.f32 %v972_v32, %v969_v31  ;;  %v663_v48 = vmul.f32 %v661_v46, %v657_v47 }
 0x465   : > { %v1078_v34 = vld [vmem:[#allocation3 + $0x8] sm:$0xff] }
 0x466   : > { %974 = vst.msk [vmem:[#allocation3 + $0x18] sm:$0xff] %vm249_vm2, %v973_v33  ;;  %1351 = vrcp.f32 %v1078_v34 }
 0x467   : > { %v859_v50 = vpop.permute.xlu1 %858 }
 0x469   : > { %v1095_v36 = vld [vmem:[#allocation3 + $0x10] sm:$0xff]  ;;  %v1066_v37 = vld [vmem:[#allocation3] sm:$0xff] }
 0x46a   : > { %1353 = vrcp.f32 %v1095_v36 }
 0x46b   : > { %v463_v38 = vpop.permute.xlu0 %462  ;;  %1355 = vrcp.f32 %v1066_v37 }
 0x46c   : > { %v465_v39 = vmul.f32 %v463_v38, %v459_v35 }
 0x46d   : > { %v1112_v40 = vld [vmem:[#allocation3 + $0x18] sm:$0xff] }
 0x46e   : > { %v466_v41 = vadd.f32 %v465_v39, %v1521_v28  ;;  %1357 = vrcp.f32 %v1112_v40  ;;  %v861_v28 = vmul.f32 %v859_v50, %v855_v49 }
 0x46f   : > { %v1057_v55 = vpop.permute.xlu0 %1056 }
 0x470   : > { %467 = vst.msk [vmem:[#allocation4] sm:$0xff] %vm258_vm0, %v466_v41  ;;  %v1059_v59 = vmul.f32 %v1057_v55, %v1053_v54 }
 0x473   : > { %v1352_v42 = vpop.eup %1351 }
 0x474   : > { %1084 = vperm.xlu0 %1333, %v1352_v42  }
 0x477   : > { %v1354_v43 = vpop.eup %1353  ;;  %v1068_v6 = vld [vmem:[#allocation4] sm:$0xff] }
 0x478   : > { %v1356_v44 = vpop.eup %1355  ;;  %1101 = vperm.xlu0 %1333, %v1354_v43  }
 0x479   : > { %1071 = vperm.xlu1 %1334, %v1356_v44  }
 0x47b   : > { %v1358_v45 = vpop.eup %1357 }
 0x47c   : > { %1118 = vperm.xlu0 %1333, %v1358_v45  }
 0x491   : > { %v652_v51 = vpop.f32.mrf.mxu0 }
 0x492   : > { %v664_v52 = vadd.f32 %v663_v48, %v652_v51 }
 0x493   : > { %v1278_v53 = vpop.f32.mrf.mxu0 }
 0x494   : > { %665 = vst.msk [vmem:[#allocation4 + $0x8] sm:$0xff] %vm258_vm0, %v664_v52 }
 0x495   : > { %v850_v56 = vpop.f32.mrf.mxu0 }
 0x496   : > { %v862_v57 = vadd.f32 %v861_v28, %v850_v56 }
 0x497   : > { %v1288_v58 = vpop.f32.mrf.mxu0 }
 0x498   : > { %863 = vst.msk [vmem:[#allocation4 + $0x10] sm:$0xff] %vm258_vm0, %v862_v57 }
 0x499   : > { %v1048_v60 = vpop.f32.mrf.mxu0 }
 0x49a   : > { %v1060_v61 = vadd.f32 %v1059_v59, %v1048_v60 }
 0x49b   : > { %v1298_v62 = vpop.f32.mrf.mxu0  ;;  %v1081_v1 = vld [vmem:[#allocation4 + $0x8] sm:$0xff] }
 0x49c   : > { %1061 = vst.msk [vmem:[#allocation4 + $0x18] sm:$0xff] %vm258_vm0, %v1060_v61 }
 0x49f   : > { %v1098_v4 = vld [vmem:[#allocation4 + $0x10] sm:$0xff] }
 0x4a3   : > { %v1115_v10 = vld [vmem:[#allocation4 + $0x18] sm:$0xff] }
 0x4ef   : > { %v1085_v63 = vpop.permute.xlu0 %1084 }
 0x4f0   : > { %v1087_v2 = vmul.f32 %v1085_v63, %v1081_v1 }
 0x4f2   : > { %1089 = vrot.lane.b32.xlu1 %v1087_v2, %s1390_s29 }
 0x4f3   : > { %v1102_v3 = vpop.permute.xlu0 %1101 }
 0x4f4   : > { %v1104_v5 = vmul.f32 %v1102_v3, %v1098_v4  ;;  %v1072_v7 = vpop.permute.xlu1 %1071 }
 0x4f5   : > { %v1074_v8 = vmul.f32 %v1072_v7, %v1068_v6 }
 0x4f6   : > { %1106 = vrot.lane.b32.xlu1 %v1104_v5, %s1391_s6 }
 0x4f7   : > { %1076 = vst.msk [vmem:[%s243_s5] sm:$0xff] %vm258_vm0, %v1074_v8  ;;  %v1119_v9 = vpop.permute.xlu0 %1118 }
 0x4f8   : > { %v1121_v11 = vmul.f32 %v1119_v9, %v1115_v10 }
 0x4fa   : > { %1123 = vrot.lane.b32.xlu1 %v1121_v11, %s1392_s7 }
 0x564   : > { %v1090_v12 = vpop.permute.xlu1 %1089 }
 0x565   : > { %1093 = vst.msk [vmem:[%s243_s5] sm:$0xff] %vm1092_vm4, %v1090_v12 }
 0x568   : > { %v1107_v14 = vpop.permute.xlu1 %1106 }
 0x569   : > { %1110 = vst.msk [vmem:[%s243_s5] sm:$0xff] %vm1109_vm5, %v1107_v14 }
 0x56c   : > { %v1124_v17 = vpop.permute.xlu1 %1123 }
 0x56d   : > { %1127 = vst.msk [vmem:[%s243_s5] sm:$0xff] %vm1126_vm6, %v1124_v17 }
 0x56e PF: > { %s13_s14 = sadd.s32 1, %s1381_s14   ;;  %s1585_s12 = smov %s1377_s13 }
 0x56f   : > { %p10_p5 = scmp.ge.s32.totalorder %s13_s14, 4   ;;  %s1586_s13 = smov %s1588_s15 }
 0x571   :  { %12 = sbr.rel (!%p10_p5) target bundleno = 2 (0x2), region = 95 }

// kernel: decoder_layer.7
= control target key start
LH: loop header
LB: loop body
LE: loop exit
PB: predicated region body
PF: predicated region fallthrough
CT: control target
= control target key end

     0   :  { %vm29_vm0 = vcmask 261120   ;;  %s640_s0 = inlined_call_operand.vmem [shape: f32[16,32], index: 0, kind: input, shape index: {}]   ;;  %s641_s1 = inlined_call_operand.vmem [shape: f32[1,32], index: 1, kind: input, shape index: {}]   ;;  %s642_s2 = inlined_call_operand.vmem [shape: f32[32,128], index: 2, kind: input, shape index: {}]   ;;  %s643_s3 = inlined_call_operand.vmem [shape: f32[32,128], index: 3, kind: input, shape index: {}]   ;;  %s644_s4 = inlined_call_operand.vmem [shape: f32[128,32], index: 4, kind: input, shape index: {}]   ;;  %s645_s5 = inlined_call_operand.hbm [shape: f32[16,32], index: 5, kind: output, shape index: {}]  }
   0x1   :  { %v533_v0 = vld [vmem:[%s640_s0] sm:$0xff]  ;;  %v538_v1 = vld [vmem:[%s640_s0 + $0x8] sm:$0xff] }
   0x2   :  { %v27_v2 = vmul.f32 %v533_v0, %v533_v0  ;;  %v28_v3 = vmul.f32 %v538_v1, %v538_v1 }
   0x3   :  { %10 = vsyncpa [#allocation5], 0  ;;  %v62_v6 = vld [vmem:[%s642_s2 + $0x18] sm:$0xff]  ;;  %v61_v7 = vld [vmem:[%s642_s2 + $0x10] sm:$0xff]  ;;  %v496_v45 = vmov 0.0  }
   0x4   :  { %v30_v4 = vsel %vm29_vm0, %v27_v2, 0.0  ;;  %v33_v5 = vsel %vm29_vm0, %v28_v3, 0.0  ;;  %401 = vmatprep.subr.mxu1 %v62_v6  ;;  %v60_v8 = vld [vmem:[%s642_s2 + $0x8] sm:$0xff]  ;;  %v59_v9 = vld [vmem:[%s642_s2] sm:$0xff]  ;;  %v148_v10 = vld [vmem:[%s643_s3 + $0x18] sm:$0xff]  ;;  %56 = vst.msk [vmem:[#allocation3 + $0x8] sm:$0xff] %vm29_vm0, %v496_v45 }
   0x5   :  { %31 = vadd.xlane.f32.xlu0 %v30_v4  ;;  %402 = vmatpush3.msra.mxu1 %v62_v6  ;;  %v364_v18 = vld [vmem:[%s641_s1] ss:$0 sm:$0xff]  ;;  %v147_v26 = vld [vmem:[%s643_s3 + $0x10] sm:$0xff]  ;;  %v146_v27 = vld [vmem:[%s643_s3 + $0x8] sm:$0xff]  ;;  %55 = vst.msk [vmem:[#allocation3] sm:$0xff] %vm29_vm0, %v496_v45 }
   0x6   :  { %403 = vmatprep.subr.mxu1 %v61_v7  ;;  %v145_v28 = vld [vmem:[%s643_s3] sm:$0xff]  ;;  %v257_v29 = vld [vmem:[%s644_s4 + $0x78] sm:$0xff]  ;;  %v256_v30 = vld [vmem:[%s644_s4 + $0x70] sm:$0xff] }
   0x7   :  { %404 = vmatpush3.msra.mxu1 %v61_v7  ;;  %423 = vmatprep.subr.mxu0 %v257_v29  ;;  %v255_v31 = vld [vmem:[%s644_s4 + $0x68] sm:$0xff]  ;;  %v254_v32 = vld [vmem:[%s644_s4 + $0x60] sm:$0xff]  ;;  %v253_v33 = vld [vmem:[%s644_s4 + $0x58] sm:$0xff] }
   0x8   :  { %405 = vmatprep.subr.mxu1 %v60_v8  ;;  %424 = vmatpush3.msra.mxu0 %v257_v29  ;;  %v252_v34 = vld [vmem:[%s644_s4 + $0x50] sm:$0xff]  ;;  %v251_v35 = vld [vmem:[%s644_s4 + $0x48] sm:$0xff]  ;;  %v250_v36 = vld [vmem:[%s644_s4 + $0x40] sm:$0xff] }
   0x9   :  { %34 = vadd.xlane.f32.xlu0 %v33_v5  ;;  %406 = vmatpush3.msra.mxu1 %v60_v8  ;;  %v249_v37 = vld [vmem:[%s644_s4 + $0x38] sm:$0xff]  ;;  %v248_v38 = vld [vmem:[%s644_s4 + $0x30] sm:$0xff]  ;;  %v247_v39 = vld [vmem:[%s644_s4 + $0x28] sm:$0xff] }
   0xa   :  { %407 = vmatprep.subr.mxu1 %v59_v9  ;;  %425 = vmatprep.subr.mxu0 %v256_v30  ;;  %v246_v40 = vld [vmem:[%s644_s4 + $0x20] sm:$0xff]  ;;  %v245_v41 = vld [vmem:[%s644_s4 + $0x18] sm:$0xff]  ;;  %v244_v42 = vld [vmem:[%s644_s4 + $0x10] sm:$0xff] }
   0xb   :  { %408 = vmatpush3.msra.mxu1 %v59_v9  ;;  %426 = vmatpush3.msra.mxu0 %v256_v30  ;;  %v243_v43 = vld [vmem:[%s644_s4 + $0x8] sm:$0xff]  ;;  %v242_v44 = vld [vmem:[%s644_s4] sm:$0xff]  ;;  %v241_v62 = vld [vmem:[#allocation3 + $0x8] sm:$0xff]  ;;  %s497_s4 = smov [#allocation4]  }
   0xc   :  { %412 = vmatprep.subr.mxu1 %v148_v10  ;;  %427 = vmatprep.subr.mxu0 %v255_v31  ;;  %v240_v2 = vld [vmem:[#allocation3] sm:$0xff]  ;;  %s353_s15 = sshll.u32 %s497_s4, 4  ;;  %s354_s15 = int_to_ptr.vmem [resolvable:$true] %s353_s15 }
   0xd   :  { %428 = vmatpush3.msra.mxu0 %v255_v31  ;;  %s474_s16 = scalar_lea.vmem %s354_s15, 256  ;;  %p479_p1 = scmp.lt.s32.totalorder %s354_s15, %s354_s15 }
   0xe   :  { %429 = vmatprep.subr.mxu0 %v254_v32  ;;  %p475_p0 = scmp.ne.s32.totalorder %s354_s15, %s474_s16  ;;  %p480_p2 = scmp.lt.s32.totalorder %s474_s16, %s474_s16 }
   0xf   :  { %430 = vmatpush3.msra.mxu0 %v254_v32 }
  0x10   :  { %431 = vmatprep.subr.mxu0 %v253_v33  ;;  %p481_p3 = por %p480_p2, %p479_p1 }
  0x11   :  { %432 = vmatpush3.msra.mxu0 %v253_v33 }
  0x12   :  { %433 = vmatprep.subr.mxu0 %v252_v34  ;;  %p482_p4 = pnand %p481_p3, %p475_p0 }
  0x13   :  { %434 = vmatpush3.msra.mxu0 %v252_v34 }
  0x14   :  { %435 = vmatprep.subr.mxu0 %v251_v35 }
  0x15   :  { %436 = vmatpush3.msra.mxu0 %v251_v35 }
  0x16   :  { %437 = vmatprep.subr.mxu0 %v250_v36 }
  0x17   :  { %438 = vmatpush3.msra.mxu0 %v250_v36 }
  0x18   :  { %439 = vmatprep.subr.mxu0 %v249_v37 }
  0x19   :  { %440 = vmatpush3.msra.mxu0 %v249_v37 }
  0x1a   :  { %441 = vmatprep.subr.mxu0 %v248_v38 }
  0x1b   :  { %442 = vmatpush3.msra.mxu0 %v248_v38 }
  0x1c   :  { %443 = vmatprep.subr.mxu0 %v247_v39 }
  0x1d   :  { %444 = vmatpush3.msra.mxu0 %v247_v39 }
  0x1e   :  { %445 = vmatprep.subr.mxu0 %v246_v40 }
  0x1f   :  { %446 = vmatpush3.msra.mxu0 %v246_v40 }
  0x20   :  { %447 = vmatprep.subr.mxu0 %v245_v41 }
  0x21   :  { %448 = vmatpush3.msra.mxu0 %v245_v41 }
  0x22   :  { %449 = vmatprep.subr.mxu0 %v244_v42 }
  0x23   :  { %450 = vmatpush3.msra.mxu0 %v244_v42 }
  0x24   :  { %451 = vmatprep.subr.mxu0 %v243_v43 }
  0x25   :  { %452 = vmatpush3.msra.mxu0 %v243_v43 }
  0x26   :  { %453 = vmatprep.subr.mxu0 %v242_v44 }
  0x27   :  { %454 = vmatpush3.msra.mxu0 %v242_v44 }
  0x8e   :  { %v32_v11 = vpop.xlane.xlu0 %31 }
  0x8f   :  { %v36_v12 = vmul.f32 0.03125, %v32_v11 }
  0x91   :  { %v38_v13 = vadd.f32 1e-05, %v36_v12 }
  0x92   :  { %v35_v14 = vpop.xlane.xlu0 %34 }
  0x93   :  { %462 = vrsqrt.f32 %v38_v13  ;;  %v37_v15 = vmul.f32 0.03125, %v35_v14 }
  0x95   :  { %v39_v16 = vadd.f32 1e-05, %v37_v15 }
  0x97   :  { %464 = vrsqrt.f32 %v39_v16 }
  0xa0   :  { %v463_v17 = vpop.eup %462 }
  0xa1   :  { %v42_v19 = vmul.f32 %v463_v17, %v533_v0 }
  0xa3   :  { %v51_v20 = vmul.f32 %v364_v18, %v42_v19 }
  0xa4   :  { %v465_v21 = vpop.eup %464 }
  0xa5   :  { %53 = vst.msk [vmem:[#allocation2] sm:$0xff] %vm29_vm0, %v51_v20  ;;  %v43_v22 = vmul.f32 %v465_v21, %v538_v1 }
  0xa7   :  { %v52_v23 = vmul.f32 %v364_v18, %v43_v22 }
  0xa9   :  { %54 = vst.msk [vmem:[#allocation2 + $0x8] sm:$0xff] %vm29_vm0, %v52_v23 }
  0xac   :  { %v57_v24 = vld [vmem:[#allocation2] sm:$0xff] }
  0xad   :  { %409 = vmatprep.mubr.msk.f32.mxu1 %vm29_vm0, %v57_v24 }
  0xb0   :  { %v58_v25 = vld [vmem:[#allocation2 + $0x8] sm:$0xff] }
  0xb1   :  { %410 = vmatmul.mubr.msk.f32.vlgmr.msra.gmra.mxu1 %vm29_vm0, %v58_v25 }
  0xb2   :  { %413 = vmatpush3.msra.mxu1 %v148_v10  ;;  %420 = vmatprep.mubr.msk.f32.mxu1 %vm29_vm0, %v57_v24 }
  0xb3   :  { %414 = vmatprep.subr.mxu1 %v147_v26 }
  0xb4   :  { %415 = vmatpush3.msra.mxu1 %v147_v26 }
  0xb5   :  { %416 = vmatprep.subr.mxu1 %v146_v27 }
  0xb6   :  { %417 = vmatpush3.msra.mxu1 %v146_v27 }
  0xb7   :  { %418 = vmatprep.subr.mxu1 %v145_v28 }
  0xb8   :  { %419 = vmatpush3.msra.mxu1 %v145_v28 }
  0xb9   :  { %421 = vmatmul.mubr.msk.f32.vlgmr.msra.gmra.mxu1 %vm29_vm0, %v58_v25 }
 0x171   :  { %v411_v46 = vpop.f32.mrf.mxu1 }
 0x172   :  { %v370_v47 = vmul.f32 -1.442695, %v411_v46 }
 0x173   :  { %v136_v48 = vpop.f32.mrf.mxu1 }
 0x174   :  { %466 = vpow2.f32 %v370_v47  ;;  %v369_v49 = vmul.f32 -1.442695, %v136_v48 }
 0x176   :  { %468 = vpow2.f32 %v369_v49 }
 0x179   :  { %v422_v55 = vpop.f32.mrf.mxu1 }
 0x17b   :  { %v215_v59 = vpop.f32.mrf.mxu1 }
 0x181   :  { %v467_v50 = vpop.eup %466 }
 0x182   :  { %v231_v51 = vadd.f32 1.0, %v467_v50 }
 0x183   :  { %v469_v52 = vpop.eup %468 }
 0x184   :  { %470 = vrcp.f32 %v231_v51  ;;  %v230_v53 = vadd.f32 1.0, %v469_v52 }
 0x186   :  { %472 = vrcp.f32 %v230_v53 }
 0x191   :  { %v471_v54 = vpop.eup %470 }
 0x192   :  { %v237_v57 = vmul.f32 %v471_v54, %v411_v46 }
 0x193   :  { %v473_v56 = vpop.eup %472 }
 0x194   :  { %v236_v58 = vmul.f32 %v473_v56, %v136_v48  ;;  %v239_v61 = vmul.f32 %v422_v55, %v237_v57 }
 0x196   :  { %v238_v60 = vmul.f32 %v236_v58, %v215_v59 }
 0x198   :  { %455 = vmatprep.mubr.f32.mxu0 %v238_v60 }
 0x199   :  { %456 = vmatmul.mubr.f32.vlgmr.msra.gmra.mxu0 %v239_v61 }
 0x259   :  { %v457_v63 = vpop.f32.mrf.mxu0 }
 0x25a   :  { %v334_v3 = vadd.f32 %v457_v63, %v241_v62 }
 0x25b   :  { %v324_v4 = vpop.f32.mrf.mxu0 }
 0x25c   :  { %336 = vst.msk [vmem:[#allocation3 + $0x8] sm:$0xff] %vm29_vm0, %v334_v3  ;;  %v333_v5 = vadd.f32 %v324_v4, %v240_v2 }
 0x25e   :  { %335 = vst.msk [vmem:[#allocation3] sm:$0xff] %vm29_vm0, %v333_v5 }
 0x263   :  { %v343_v6 = vld [vmem:[#allocation3 + $0x8] sm:$0xff] }
 0x264   :  { %v345_v7 = vadd.f32 %v343_v6, %v538_v1 }
 0x265   :  { %v342_v8 = vld [vmem:[#allocation3] sm:$0xff] }
 0x266   :  { %v344_v9 = vadd.f32 %v342_v8, %v533_v0  ;;  %347 = vst.msk [vmem:[#allocation4 + $0x8] sm:$0xff] %vm29_vm0, %v345_v7 }
 0x268   :  { %346 = vst.msk [vmem:[#allocation4] sm:$0xff] %vm29_vm0, %v344_v9 }
 0x269   :  { %485 = shalt.err (!%p482_p4)
}
 0x26a   :  { %s498_s3 = smov 128   ;;  %s499_s17 = smov 8  }
 0x26b   :  { %359 = dma.vmem_to_hbm [thread:$0]  %s354_s15, 256, %s645_s5, [#allocation5], %s498_s3, %s498_s3, %s499_s17  }
 0x26c   :  { %494 = dma.done.wait [#allocation5], 256  }
 0x26d   :  { %495 = vsyncadd [#allocation5], 4294967040 }
 0x26e   :  { %363 = vsyncpa [#allocation5], 1 }

</bundles_post_ra>
